<compile_context>
chip_gen: v7x
topology: tpu7x:2x2x1
jax: 0.10.0
libtpu: 0.0.40
codegen_flags: <defaults>
</compile_context>

<pallas_src>
import functools

import jax
import jax.numpy as jnp
from jax import lax
from jax.experimental import pallas as pl
from jax.experimental.pallas import tpu as pltpu

EPS = 1e-5
LANE = 128
_MIB = 1024 * 1024
# If the (region-padded) image tensor is at most this many bytes, use the single fused
# head kernel (one HBM pass, one launch).  Intermediates are ~4-5x this inside VMEM.
FUSED_IM_BYTES_MAX = 4 * _MIB


def _round_up(x, m):
    return (x + m - 1) // m * m


def _sigmoid(x):
    # sigmoid(x) == 0.5 * (tanh(x/2) + 1): a single EUP transcendental per element.
    return 0.5 * jnp.tanh(0.5 * x) + 0.5


# --------------------------------------------------------------------------------------
# Kernel 1: masked LSTM (pack semantics), batch-tiled grid.
#   Hidden size is zero-padded to Hp = round_up(H, 128) (exact math - padded channels
#   stay 0) so the i/f/g/o gate slices are 128-lane aligned.
# --------------------------------------------------------------------------------------
def _lstm_kernel(emb_ref, len_ref, h0_ref, c0_ref, wih_ref, whh_ref, b_ref,
                 hn_ref, xproj_ref):
    T, TB, E = emb_ref.shape
    Hp = h0_ref.shape[1]
    lens = len_ref[...]                      # (TB, 1) int32
    whh = whh_ref[...]                       # (Hp, 4Hp)

    # Hoisted input projection: one (T*TB, E) @ (E, 4Hp) matmul + bias.
    xflat = emb_ref[...].reshape(T * TB, E)  # free reshape: TB % 8 == 0
    xp = jnp.dot(xflat, wih_ref[...], preferred_element_type=jnp.float32) + b_ref[...]
    xproj_ref[...] = xp.reshape(T, TB, 4 * Hp)

    # TODO(synk): holding W_hh in MXU weight regs across the T unrolled steps
    # (pltpu.matmul_push_rhs / matmul_acc_lhs / matmul_pop) would remove T-1 RHS loads;
    # kept on jnp.dot for lowering robustness.
    def step(t, carry):
        h, c = carry
        gates = xproj_ref[t] + jnp.dot(h, whh, preferred_element_type=jnp.float32)
        i = _sigmoid(gates[:, 0 * Hp:1 * Hp])
        f = _sigmoid(gates[:, 1 * Hp:2 * Hp])
        g = jnp.tanh(gates[:, 2 * Hp:3 * Hp])
        o = _sigmoid(gates[:, 3 * Hp:4 * Hp])
        c_new = f * c + i * g
        h_new = o * jnp.tanh(c_new)
        mask = t < lens                      # (TB, 1) bool, broadcasts over Hp
        return jnp.where(mask, h_new, h), jnp.where(mask, c_new, c)

    h, _ = lax.fori_loop(0, T, step, (h0_ref[...], c0_ref[...]), unroll=True)
    hn_ref[...] = h


def _pick_lstm_tile(B, T, Hp, E, budget=8 * _MIB):
    per_row = T * (4 * Hp + 2 * E) * 4           # xproj scratch + double-buffered emb
    cap = max(8, (budget // max(per_row, 1)) // 8 * 8)
    b8 = _round_up(B, 8)
    tb = min(b8, cap)
    if tb >= b8 and b8 >= 16:                    # split so both TCs (v7x) get work
        tb = max(8, (b8 // 2) // 8 * 8)
    return tb


def lstm_hidden(emb_tbe, lengths, h0p, c0p, w_ih_p, w_hh_p, b_p, *, batch_tile=None):
    T, B, E = emb_tbe.shape
    Hp = h0p.shape[1]
    tb = batch_tile or _pick_lstm_tile(B, T, Hp, E)
    tb = max(8, (min(tb, _round_up(B, 8)) // 8) * 8)
    b_pad = _round_up(B, tb)
    if b_pad != B:                               # padded rows: len 0 -> hn stays 0
        emb_tbe = jnp.pad(emb_tbe, ((0, 0), (0, b_pad - B), (0, 0)))
        lengths = jnp.pad(lengths, ((0, b_pad - B),))
        h0p = jnp.pad(h0p, ((0, b_pad - B), (0, 0)))
        c0p = jnp.pad(c0p, ((0, b_pad - B), (0, 0)))
    lengths_b1 = lengths.astype(jnp.int32)[:, None]

    est = (2 * T * tb * E + T * tb * 4 * Hp + E * 4 * Hp + Hp * 4 * Hp
           + 3 * tb * Hp) * 4
    hn = pl.pallas_call(
        _lstm_kernel,
        out_shape=jax.ShapeDtypeStruct((b_pad, Hp), jnp.float32),
        grid=(b_pad // tb,),
        in_specs=[
            pl.BlockSpec((T, tb, E), lambda i: (0, i, 0)),
            pl.BlockSpec((tb, 1), lambda i: (i, 0)),
            pl.BlockSpec((tb, Hp), lambda i: (i, 0)),
            pl.BlockSpec((tb, Hp), lambda i: (i, 0)),
            pl.BlockSpec((E, 4 * Hp), lambda i: (0, 0)),
            pl.BlockSpec((Hp, 4 * Hp), lambda i: (0, 0)),
            pl.BlockSpec((1, 4 * Hp), lambda i: (0, 0)),
        ],
        out_specs=pl.BlockSpec((tb, Hp), lambda i: (i, 0)),
        scratch_shapes=[pltpu.VMEM((T, tb, 4 * Hp), jnp.float32)],
        compiler_params=pltpu.CompilerParams(
            dimension_semantics=("parallel",),
            vmem_limit_bytes=int(min(96 * _MIB, max(32 * _MIB, 2 * est)))),
    )(emb_tbe, lengths_b1, h0p, c0p, w_ih_p, w_hh_p, b_p)
    return hn[:B]


# --------------------------------------------------------------------------------------
# Kernel 2 (large path): tiled reduction for image BatchNorm statistics.
#   2D grid: feature axis "parallel" (megacore on v7x), row axis "arbitrary" accumulation.
# --------------------------------------------------------------------------------------
def _im_stats_kernel(im_ref, s1_ref, s2_ref):
    @pl.when(pl.program_id(1) == 0)
    def _():
        s1_ref[...] = jnp.zeros_like(s1_ref)
        s2_ref[...] = jnp.zeros_like(s2_ref)
    x = im_ref[...]                                       # (row_tile, f_tile)
    s1_ref[...] += jnp.sum(x, axis=0, keepdims=True)
    s2_ref[...] += jnp.sum(x * x, axis=0, keepdims=True)


def im_feature_stats(im2, *, row_tile=None):
    # TODO(synk): E[x^2]-E[x]^2 can cancel for features with large mean/std ratio
    # (real fc7 activations); fine for this scale / random data.
    N, F = im2.shape
    f_tile = 128 if F % 128 == 0 else F
    rt = row_tile or 1024
    rt = min(_round_up(rt, 8), _round_up(N, 8))
    n_pad = _round_up(N, rt)
    if n_pad != N:
        im2 = jnp.pad(im2, ((0, n_pad - N), (0, 0)))      # zero rows don't change sums
    grid = (F // f_tile, n_pad // rt)
    s1, s2 = pl.pallas_call(
        _im_stats_kernel,
        out_shape=(jax.ShapeDtypeStruct((1, F), jnp.float32),
                   jax.ShapeDtypeStruct((1, F), jnp.float32)),
        grid=grid,
        in_specs=[pl.BlockSpec((rt, f_tile), lambda fi, ri: (ri, fi))],
        out_specs=(pl.BlockSpec((1, f_tile), lambda fi, ri: (0, fi)),
                   pl.BlockSpec((1, f_tile), lambda fi, ri: (0, fi))),
        compiler_params=pltpu.CompilerParams(
            dimension_semantics=("parallel", "arbitrary"),
            vmem_limit_bytes=32 * _MIB),
    )(im2)
    return s1, s2


# --------------------------------------------------------------------------------------
# Kernel 3 (large path): grounding head, batch-tiled.  Image BN pre-folded into
#   (w_eff, b_eff); phrase BN pre-folded into (w_ph_eff, b_ph_eff).
# --------------------------------------------------------------------------------------
def _head_kernel(h_ref, im_ref, wph_ref, bph_ref, weff_ref, beff_ref, wat_ref, bat_ref,
                 out_ref, *, n_regions):
    im = im_ref[...]                                      # (tb, R8, F)
    TB, R8, F = im.shape
    C = wph_ref.shape[1]

    ph = jnp.dot(h_ref[...], wph_ref[...], preferred_element_type=jnp.float32) + bph_ref[...]
    proj = (jnp.dot(im.reshape(TB * R8, F), weff_ref[...],
                    preferred_element_type=jnp.float32) + beff_ref[...])     # (TB*R8, C)
    out = jnp.maximum(proj.reshape(TB, R8, C) + ph[:, None, :], 0.0)

    logits = jnp.sum(out * wat_ref[...].reshape(1, 1, C), axis=-1) + bat_ref[0, 0]
    ridx = lax.broadcasted_iota(jnp.int32, (TB, R8), 1)
    logits = jnp.where(ridx < n_regions, logits, -1e30)   # mask padded regions
    m = jnp.max(logits, axis=1, keepdims=True)
    e = jnp.exp(logits - m)
    out_ref[...] = e / jnp.sum(e, axis=1, keepdims=True)


def _pick_head_tile(B, R8, F, C, Hp, budget=16 * _MIB):
    per_row = R8 * F * 4                                  # one batch row of the im block
    fixed = (F * C + Hp * C + 8 * C) * 4                  # resident weights / biases
    avail = max(budget - fixed, 2 * per_row * 8)
    tb = (avail // (2 * per_row)) // 8 * 8                # double-buffered im tile
    return int(max(8, min(_round_up(B, 8), tb)))


def grounding_head(hn, im_p, w_ph_eff, b_ph_eff, w_eff, b_eff, w_attn, b_attn,
                   n_regions, *, batch_tile=None):
    B, R8, F = im_p.shape
    Hp = hn.shape[1]
    C = w_ph_eff.shape[1]
    tb = batch_tile or _pick_head_tile(B, R8, F, C, Hp)
    tb = max(8, (min(tb, _round_up(B, 8)) // 8) * 8)
    b_pad = _round_up(B, tb)
    if b_pad != B:
        hn = jnp.pad(hn, ((0, b_pad - B), (0, 0)))
        im_p = jnp.pad(im_p, ((0, b_pad - B), (0, 0), (0, 0)))

    est = (2 * tb * R8 * F + F * C + Hp * C + 2 * tb * R8 * C + tb * Hp) * 4 + 2 * _MIB
    attn = pl.pallas_call(
        functools.partial(_head_kernel, n_regions=n_regions),
        out_shape=jax.ShapeDtypeStruct((b_pad, R8), jnp.float32),
        grid=(b_pad // tb,),
        in_specs=[
            pl.BlockSpec((tb, Hp), lambda i: (i, 0)),         # hn (per batch tile)
            pl.BlockSpec((tb, R8, F), lambda i: (i, 0, 0)),   # image features (streamed)
            pl.BlockSpec((Hp, C), lambda i: (0, 0)),          # folded phrase-BN weight
            pl.BlockSpec((1, C), lambda i: (0, 0)),           # folded phrase-BN bias
            pl.BlockSpec((F, C), lambda i: (0, 0)),           # folded image-BN weight
            pl.BlockSpec((1, C), lambda i: (0, 0)),           # folded image-BN bias
            pl.BlockSpec((1, C), lambda i: (0, 0)),           # attention weight
            pl.BlockSpec(memory_space=pltpu.MemorySpace.SMEM),  # attention bias scalar
        ],
        out_specs=pl.BlockSpec((tb, R8), lambda i: (i, 0)),
        compiler_params=pltpu.CompilerParams(
            dimension_semantics=("parallel",),
            vmem_limit_bytes=int(min(96 * _MIB, max(32 * _MIB, est)))),
    )(hn, im_p, w_ph_eff, b_ph_eff, w_eff, b_eff, w_attn, b_attn)
    return attn[:B, :n_regions]


# --------------------------------------------------------------------------------------
# Kernel 4 (small path): single fused head.  Reads im_input once from VMEM, computes
#   image-BN stats (centered, with exact correction for zero-padded region rows),
#   normalizes, projects, adds the phrase projection, ReLU, attention, softmax.
# --------------------------------------------------------------------------------------
def _fused_head_kernel(h_ref, im_ref, wph_ref, bph_ref, wim_ref, bim_ref, wat_ref,
                       bat_ref, out_ref, *, n_regions, n_stat_rows):
    im = im_ref[...]                                      # (B, R8, F)
    B, R8, F = im.shape
    C = wph_ref.shape[1]

    im2 = im.reshape(B * R8, F)
    inv_n = 1.0 / float(n_stat_rows)
    mu = jnp.sum(im2, axis=0, keepdims=True) * inv_n      # pads are zero -> sum exact
    d = im2 - mu
    ss = jnp.sum(d * d, axis=0, keepdims=True)
    pad_rows = float(B * R8 - n_stat_rows)                # each padded row adds mu^2
    var = (ss - pad_rows * (mu * mu)) * inv_n
    imbn = d * lax.rsqrt(var + EPS)

    proj = (jnp.dot(imbn, wim_ref[...], preferred_element_type=jnp.float32)
            + bim_ref[...])                               # (B*R8, C)
    ph = jnp.dot(h_ref[...], wph_ref[...], preferred_element_type=jnp.float32) + bph_ref[...]
    out = jnp.maximum(proj.reshape(B, R8, C) + ph[:, None, :], 0.0)

    logits = jnp.sum(out * wat_ref[...].reshape(1, 1, C), axis=-1) + bat_ref[0, 0]
    ridx = lax.broadcasted_iota(jnp.int32, (B, R8), 1)
    logits = jnp.where(ridx < n_regions, logits, -1e30)
    m = jnp.max(logits, axis=1, keepdims=True)
    e = jnp.exp(logits - m)
    out_ref[...] = e / jnp.sum(e, axis=1, keepdims=True)


def fused_grounding_head(hn, im_p, w_ph_eff, b_ph_eff, w_im_T, b_im, w_attn, b_attn,
                         n_regions, n_stat_rows):
    B, R8, F = im_p.shape
    Hp = hn.shape[1]
    C = w_ph_eff.shape[1]
    vmem = pl.BlockSpec(memory_space=pltpu.MemorySpace.VMEM)
    est = (5 * B * R8 * F + 2 * B * R8 * C + F * C + Hp * C) * 4 + 2 * _MIB
    attn = pl.pallas_call(
        functools.partial(_fused_head_kernel, n_regions=n_regions,
                          n_stat_rows=n_stat_rows),
        out_shape=jax.ShapeDtypeStruct((B, R8), jnp.float32),
        in_specs=[vmem] * 7 + [pl.BlockSpec(memory_space=pltpu.MemorySpace.SMEM)],
        out_specs=vmem,
        compiler_params=pltpu.CompilerParams(
            vmem_limit_bytes=int(min(96 * _MIB, max(32 * _MIB, est)))),
    )(hn, im_p, w_ph_eff, b_ph_eff, w_im_T, b_im, w_attn, b_attn)
    return attn[:, :n_regions]


# --------------------------------------------------------------------------------------
# Parameter padding / full forward (glue in plain JAX)
# --------------------------------------------------------------------------------------
def _pad_gate_cols(w, H, Hp):
    # (..., 4H) with gate order [i, f, g, o] -> (..., 4Hp), zero-padded per gate block.
    parts = [w[..., k * H:(k + 1) * H] for k in range(4)]
    pad_spec = [(0, 0)] * (w.ndim - 1) + [(0, Hp - H)]
    parts = [jnp.pad(p, pad_spec) for p in parts]
    return jnp.concatenate(parts, axis=-1)


def pad_lstm_params(params, Hp):
    H = params["w_hh_T"].shape[0]
    w_ih_p = _pad_gate_cols(params["w_ih_T"], H, Hp)                 # (E, 4Hp)
    w_hh_p = _pad_gate_cols(params["w_hh_T"], H, Hp)                 # (H, 4Hp)
    w_hh_p = jnp.pad(w_hh_p, ((0, Hp - H), (0, 0)))                  # (Hp, 4Hp)
    b_p = _pad_gate_cols(params["b_lstm"], H, Hp)                    # (1, 4Hp)
    w_ph_p = jnp.pad(params["w_ph_T"], ((0, Hp - H), (0, 0)))        # (Hp, C)
    return w_ih_p, w_hh_p, b_p, w_ph_p


def grounder_forward(params, im_input, h0, c0, tokens, lengths, *, mode="auto",
                     lstm_batch_tile=None, head_batch_tile=None, stats_row_tile=None):
    # TODO(synk): dropout layers are eval-mode identity (torch RNG semantics not replicated).
    H = params["w_hh_T"].shape[0]
    Hp = _round_up(H, LANE)
    B, R, F = im_input.shape

    emb = params["emb_table"][tokens]                   # (B, T, E) embedding gather (glue)
    emb_tbe = jnp.transpose(emb, (1, 0, 2))             # (T, B, E)

    w_ih_p, w_hh_p, b_p, w_ph_p = pad_lstm_params(params, Hp)
    h0p = jnp.pad(h0, ((0, 0), (0, Hp - H)))
    c0p = jnp.pad(c0, ((0, 0), (0, Hp - H)))

    hn = lstm_hidden(emb_tbe, lengths, h0p, c0p, w_ih_p, w_hh_p, b_p,
                     batch_tile=lstm_batch_tile)        # (B, Hp)

    # Phrase BatchNorm (global batch stats over the real B rows) folded into the ph
    # projection so batch-tiled kernels still see correct statistics.  O(B*Hp) glue.
    mu_h = jnp.mean(hn, axis=0, keepdims=True)
    var_h = jnp.mean((hn - mu_h) ** 2, axis=0, keepdims=True)
    inv_h = lax.rsqrt(var_h + EPS)                      # (1, Hp)
    w_ph_eff = w_ph_p * inv_h.reshape(Hp, 1)            # (Hp, C)
    b_ph_eff = params["b_ph"] - jnp.dot(mu_h * inv_h, w_ph_p)

    R8 = _round_up(R, 8)                                # sublane-aligned region count
    im_p = jnp.pad(im_input, ((0, 0), (0, R8 - R), (0, 0))) if R8 != R else im_input

    im_bytes = B * R8 * F * 4
    if mode == "fused" or (mode == "auto" and im_bytes <= FUSED_IM_BYTES_MAX):
        return fused_grounding_head(hn, im_p, w_ph_eff, b_ph_eff,
                                    params["w_im_T"], params["b_im"],
                                    params["w_attn"], params["b_attn"],
                                    n_regions=R, n_stat_rows=B * R)

    # Large path: tiled stats, fold image BN into the projection, batch-tiled head.
    s1, s2 = im_feature_stats(im_p.reshape(B * R8, F), row_tile=stats_row_tile)
    n = float(B * R)
    mu = s1 / n
    var = s2 / n - mu * mu
    inv = lax.rsqrt(var + EPS)                          # (1, F)
    w_eff = params["w_im_T"] * inv.reshape(F, 1)        # (F, C)
    b_eff = params["b_im"] - jnp.dot(mu * inv, params["w_im_T"])   # (1, C)
    return grounding_head(hn, im_p, w_ph_eff, b_ph_eff, w_eff, b_eff,
                          params["w_attn"], params["b_attn"], R,
                          batch_tile=head_batch_tile)


# --------------------------------------------------------------------------------------
# Pure-JAX reference (same math, no Pallas) for a sanity check.
# --------------------------------------------------------------------------------------
def reference_forward(params, im_input, h0, c0, tokens, lengths):
    emb = params["emb_table"][tokens]
    B, T, _ = emb.shape
    H = h0.shape[1]
    h, c = h0, c0
    for t in range(T):
        x_t = emb[:, t, :]
        gates = x_t @ params["w_ih_T"] + h @ params["w_hh_T"] + params["b_lstm"]
        i = jax.nn.sigmoid(gates[:, :H]); f = jax.nn.sigmoid(gates[:, H:2 * H])
        g = jnp.tanh(gates[:, 2 * H:3 * H]); o = jax.nn.sigmoid(gates[:, 3 * H:])
        c_new = f * c + i * g
        h_new = o * jnp.tanh(c_new)
        mask = (t < lengths)[:, None]
        h = jnp.where(mask, h_new, h); c = jnp.where(mask, c_new, c)
    mu = h.mean(0, keepdims=True); var = ((h - mu) ** 2).mean(0, keepdims=True)
    hbn = (h - mu) / jnp.sqrt(var + EPS)
    ph = hbn @ params["w_ph_T"] + params["b_ph"]
    B, R, F = im_input.shape
    im2 = im_input.reshape(B * R, F)
    muf = im2.mean(0, keepdims=True); varf = ((im2 - muf) ** 2).mean(0, keepdims=True)
    imbn = (im2 - muf) / jnp.sqrt(varf + EPS)
    imc = (imbn @ params["w_im_T"] + params["b_im"]).reshape(B, R, -1)
    out = jnp.maximum(ph[:, None, :] + imc, 0.0)
    logits = jnp.sum(out * params["w_attn"].reshape(1, 1, -1), axis=-1) + params["b_attn"][0, 0]
    return jax.nn.softmax(logits, axis=1)


if __name__ == "__main__":
    # Small, module-consistent shapes (concat_size matches the module default 128).
    V, E, H, C, F = 30, 32, 32, 128, 256    # vocab, lm_emb, hidden, concat, im_feature
    B, T, R = 16, 8, 8                      # batch, max seq len, num regions

    key = jax.random.PRNGKey(0)
    ks = jax.random.split(key, 12)

    params = {
        "emb_table": jax.random.normal(ks[0], (V, E), jnp.float32) * 0.1,
        "w_ih_T": jax.random.uniform(ks[1], (E, 4 * H), jnp.float32, 0.0, 1.0) * 0.1,
        "w_hh_T": jax.random.uniform(ks[2], (H, 4 * H), jnp.float32, -1.0, 1.0) / jnp.sqrt(H),
        "b_lstm": jax.random.uniform(ks[3], (1, 4 * H), jnp.float32, -1.0, 1.0) / jnp.sqrt(H),
        "w_ph_T": jax.random.normal(ks[4], (H, C), jnp.float32) * (1.0 / jnp.sqrt(H)),
        "b_ph": jax.random.normal(ks[5], (1, C), jnp.float32) * 0.01,
        "w_im_T": jax.random.normal(ks[6], (F, C), jnp.float32) * (1.0 / jnp.sqrt(F)),
        "b_im": jax.random.normal(ks[7], (1, C), jnp.float32) * 0.01,
        "w_attn": jax.random.normal(ks[8], (1, C), jnp.float32) * (1.0 / jnp.sqrt(C)),
        "b_attn": jnp.zeros((1, 1), jnp.float32),
    }

    im_input = jax.random.normal(ks[9], (B, R, F), jnp.float32)
    tokens = jax.random.randint(ks[10], (B, T), 0, V)
    lengths = jnp.sort(jax.random.randint(ks[11], (B,), 1, T + 1))[::-1].astype(jnp.int32)
    h0 = jnp.zeros((B, H), jnp.float32)                 # initHidden / initCell
    c0 = jnp.zeros((B, H), jnp.float32)

    ref = reference_forward(params, im_input, h0, c0, tokens, lengths)

    # Default (auto) path: batch-tiled LSTM grid + single fused head kernel.
    attn = grounder_forward(params, im_input, h0, c0, tokens, lengths)
    attn = jax.block_until_ready(attn)
    assert attn.shape == (B, R)
    assert bool(jnp.all(jnp.isfinite(attn)))
    assert jnp.allclose(jnp.sum(attn, axis=1), 1.0, atol=1e-5)
    assert jnp.allclose(attn, ref, atol=1e-4, rtol=5e-4)

    # Large-shape (tiled) path forced with small tiles so every kernel / grid axis /
    # accumulator is exercised at these test shapes.
    attn_tiled = grounder_forward(params, im_input, h0, c0, tokens, lengths,
                                  mode="tiled", lstm_batch_tile=8,
                                  head_batch_tile=8, stats_row_tile=64)
    attn_tiled = jax.block_until_ready(attn_tiled)
    assert attn_tiled.shape == (B, R)
    assert bool(jnp.all(jnp.isfinite(attn_tiled)))
    assert jnp.allclose(jnp.sum(attn_tiled, axis=1), 1.0, atol=1e-5)
    assert jnp.allclose(attn_tiled, ref, atol=1e-4, rtol=5e-4)

    print("KERNEL_OK")
</pallas_src>

<mosaic_0001>
module attributes {stable_mosaic.version = 11 : i64} {
  func.func @_lstm_kernel(%arg0: i32, %arg1: memref<8x8x32xf32, #tpu.memory_space<vmem>>, %arg2: memref<8x1xi32, #tpu.memory_space<vmem>>, %arg3: memref<8x128xf32, #tpu.memory_space<vmem>>, %arg4: memref<8x128xf32, #tpu.memory_space<vmem>>, %arg5: memref<32x512xf32, #tpu.memory_space<vmem>>, %arg6: memref<128x512xf32, #tpu.memory_space<vmem>>, %arg7: memref<1x512xf32, #tpu.memory_space<vmem>>, %arg8: memref<8x128xf32, #tpu.memory_space<vmem>>, %arg9: memref<8x8x512xf32, #tpu.memory_space<vmem>>) attributes {dimension_semantics = [#tpu.dimension_semantics<parallel>], iteration_bounds = array<i64: 2>, scalar_prefetch = 0 : i64, scratch_operands = 1 : i64, tpu.core_type = #tpu.core_type<tc>, window_params = [{transform_indices = @transform_0, window_bounds = array<i64: 8, 8, 32>}, {transform_indices = @transform_1, window_bounds = array<i64: 8, 1>}, {transform_indices = @transform_2, window_bounds = array<i64: 8, 128>}, {transform_indices = @transform_3, window_bounds = array<i64: 8, 128>}, {pipeline_mode = #tpu.pipeline_mode<synchronous>, transform_indices = @transform_4, window_bounds = array<i64: 32, 512>}, {pipeline_mode = #tpu.pipeline_mode<synchronous>, transform_indices = @transform_5, window_bounds = array<i64: 128, 512>}, {pipeline_mode = #tpu.pipeline_mode<synchronous>, transform_indices = @transform_6, window_bounds = array<i64: 1, 512>}, {transform_indices = @transform_7, window_bounds = array<i64: 8, 128>}]} {
    %c0 = arith.constant 0 : index
    %c0_0 = arith.constant 0 : index
    %0 = vector.load %arg2[%c0, %c0_0] : memref<8x1xi32, #tpu.memory_space<vmem>>, vector<8x1xi32>
    %c0_1 = arith.constant 0 : index
    %c0_2 = arith.constant 0 : index
    %1 = vector.load %arg6[%c0_1, %c0_2] : memref<128x512xf32, #tpu.memory_space<vmem>>, vector<128x512xf32>
    %c0_3 = arith.constant 0 : index
    %c0_4 = arith.constant 0 : index
    %c0_5 = arith.constant 0 : index
    %2 = vector.load %arg1[%c0_3, %c0_4, %c0_5] : memref<8x8x32xf32, #tpu.memory_space<vmem>>, vector<8x8x32xf32>
    %3 = vector.shape_cast %2 : vector<8x8x32xf32> to vector<64x32xf32>
    %c0_6 = arith.constant 0 : index
    %c0_7 = arith.constant 0 : index
    %4 = vector.load %arg5[%c0_6, %c0_7] : memref<32x512xf32, #tpu.memory_space<vmem>>, vector<32x512xf32>
    %cst = arith.constant dense<0.000000e+00> : vector<64x512xf32>
    %5 = tpu.matmul %3, %4, %cst {dimension_numbers = #tpu.dot_dimension_numbers<[1], [0], [0], [1], [0, 0, 1, 1], [], []>} : vector<64x32xf32>, vector<32x512xf32>, vector<64x512xf32> -> vector<64x512xf32>
    %c0_8 = arith.constant 0 : index
    %c0_9 = arith.constant 0 : index
    %6 = vector.load %arg7[%c0_8, %c0_9] : memref<1x512xf32, #tpu.memory_space<vmem>>, vector<1x512xf32>
    %7 = vector.broadcast %6 : vector<1x512xf32> to vector<64x512xf32>
    %8 = arith.addf %5, %7 : vector<64x512xf32>
    %9 = vector.shape_cast %8 : vector<64x512xf32> to vector<8x8x512xf32>
    %c0_10 = arith.constant 0 : index
    %c0_11 = arith.constant 0 : index
    %c0_12 = arith.constant 0 : index
    %10 = vector.load %arg9[%c0_10, %c0_11, %c0_12] : memref<8x8x512xf32, #tpu.memory_space<vmem>>, vector<8x8x512xf32>
    tpu.vector_store %arg9[%c0_10, %c0_11, %c0_12], %9 {strides = array<i32>} : memref<8x8x512xf32, #tpu.memory_space<vmem>>, vector<8x8x512xf32>,
    %c0_13 = arith.constant 0 : index
    %c0_14 = arith.constant 0 : index
    %11 = vector.load %arg3[%c0_13, %c0_14] : memref<8x128xf32, #tpu.memory_space<vmem>>, vector<8x128xf32>
    %c0_15 = arith.constant 0 : index
    %c0_16 = arith.constant 0 : index
    %12 = vector.load %arg4[%c0_15, %c0_16] : memref<8x128xf32, #tpu.memory_space<vmem>>, vector<8x128xf32>
    %c0_i32 = arith.constant 0 : i32
    %13 = arith.index_cast %c0_i32 : i32 to index
    %c0_17 = arith.constant 0 : index
    %c0_18 = arith.constant 0 : index
    %14 = vector.load %arg9[%13, %c0_17, %c0_18] : memref<8x8x512xf32, #tpu.memory_space<vmem>>, vector<1x8x512xf32>
    %15 = vector.shape_cast %14 : vector<1x8x512xf32> to vector<8x512xf32>
    %cst_19 = arith.constant dense<0.000000e+00> : vector<8x512xf32>
    %16 = tpu.matmul %11, %1, %cst_19 {dimension_numbers = #tpu.dot_dimension_numbers<[1], [0], [0], [1], [0, 0, 1, 1], [], []>} : vector<8x128xf32>, vector<128x512xf32>, vector<8x512xf32> -> vector<8x512xf32>
    %17 = arith.addf %15, %16 : vector<8x512xf32>
    %18 = vector.extract_strided_slice %17 {offsets = [0, 0], sizes = [8, 128], strides = [1, 1]} : vector<8x512xf32> to vector<8x128xf32>
    %cst_20 = arith.constant 5.000000e-01 : f32
    %19 = vector.broadcast %cst_20 : f32 to vector<8x128xf32>
    %20 = arith.mulf %19, %18 : vector<8x128xf32>
    %21 = math.tanh %20 : vector<8x128xf32>
    %cst_21 = arith.constant 5.000000e-01 : f32
    %22 = vector.broadcast %cst_21 : f32 to vector<8x128xf32>
    %23 = arith.mulf %22, %21 : vector<8x128xf32>
    %cst_22 = arith.constant 5.000000e-01 : f32
    %24 = vector.broadcast %cst_22 : f32 to vector<8x128xf32>
    %25 = arith.addf %23, %24 : vector<8x128xf32>
    %26 = vector.extract_strided_slice %17 {offsets = [0, 128], sizes = [8, 128], strides = [1, 1]} : vector<8x512xf32> to vector<8x128xf32>
    %cst_23 = arith.constant 5.000000e-01 : f32
    %27 = vector.broadcast %cst_23 : f32 to vector<8x128xf32>
    %28 = arith.mulf %27, %26 : vector<8x128xf32>
    %29 = math.tanh %28 : vector<8x128xf32>
    %cst_24 = arith.constant 5.000000e-01 : f32
    %30 = vector.broadcast %cst_24 : f32 to vector<8x128xf32>
    %31 = arith.mulf %30, %29 : vector<8x128xf32>
    %cst_25 = arith.constant 5.000000e-01 : f32
    %32 = vector.broadcast %cst_25 : f32 to vector<8x128xf32>
    %33 = arith.addf %31, %32 : vector<8x128xf32>
    %34 = vector.extract_strided_slice %17 {offsets = [0, 256], sizes = [8, 128], strides = [1, 1]} : vector<8x512xf32> to vector<8x128xf32>
    %35 = math.tanh %34 : vector<8x128xf32>
    %36 = vector.extract_strided_slice %17 {offsets = [0, 384], sizes = [8, 128], strides = [1, 1]} : vector<8x512xf32> to vector<8x128xf32>
    %cst_26 = arith.constant 5.000000e-01 : f32
    %37 = vector.broadcast %cst_26 : f32 to vector<8x128xf32>
    %38 = arith.mulf %37, %36 : vector<8x128xf32>
    %39 = math.tanh %38 : vector<8x128xf32>
    %cst_27 = arith.constant 5.000000e-01 : f32
    %40 = vector.broadcast %cst_27 : f32 to vector<8x128xf32>
    %41 = arith.mulf %40, %39 : vector<8x128xf32>
    %cst_28 = arith.constant 5.000000e-01 : f32
    %42 = vector.broadcast %cst_28 : f32 to vector<8x128xf32>
    %43 = arith.addf %41, %42 : vector<8x128xf32>
    %44 = arith.mulf %33, %12 : vector<8x128xf32>
    %45 = arith.mulf %25, %35 : vector<8x128xf32>
    %46 = arith.addf %44, %45 : vector<8x128xf32>
    %47 = math.tanh %46 : vector<8x128xf32>
    %48 = arith.mulf %43, %47 : vector<8x128xf32>
    %49 = vector.broadcast %c0_i32 : i32 to vector<8x1xi32>
    %50 = arith.cmpi slt, %49, %0 : vector<8x1xi32>
    %51 = vector.shape_cast %50 : vector<8x1xi1> to vector<8x1xi1>
    %52 = vector.broadcast %51 : vector<8x1xi1> to vector<8x128xi1>
    %53 = arith.select %52, %48, %11 : vector<8x128xi1>, vector<8x128xf32>
    %54 = vector.shape_cast %50 : vector<8x1xi1> to vector<8x1xi1>
    %55 = vector.broadcast %54 : vector<8x1xi1> to vector<8x128xi1>
    %56 = arith.select %55, %46, %12 : vector<8x128xi1>, vector<8x128xf32>
    %c1_i32 = arith.constant 1 : i32
    %57 = arith.index_cast %c1_i32 : i32 to index
    %c0_29 = arith.constant 0 : index
    %c0_30 = arith.constant 0 : index
    %58 = vector.load %arg9[%57, %c0_29, %c0_30] : memref<8x8x512xf32, #tpu.memory_space<vmem>>, vector<1x8x512xf32>
    %59 = vector.shape_cast %58 : vector<1x8x512xf32> to vector<8x512xf32>
    %cst_31 = arith.constant dense<0.000000e+00> : vector<8x512xf32>
    %60 = tpu.matmul %53, %1, %cst_31 {dimension_numbers = #tpu.dot_dimension_numbers<[1], [0], [0], [1], [0, 0, 1, 1], [], []>} : vector<8x128xf32>, vector<128x512xf32>, vector<8x512xf32> -> vector<8x512xf32>
    %61 = arith.addf %59, %60 : vector<8x512xf32>
    %62 = vector.extract_strided_slice %61 {offsets = [0, 0], sizes = [8, 128], strides = [1, 1]} : vector<8x512xf32> to vector<8x128xf32>
    %cst_32 = arith.constant 5.000000e-01 : f32
    %63 = vector.broadcast %cst_32 : f32 to vector<8x128xf32>
    %64 = arith.mulf %63, %62 : vector<8x128xf32>
    %65 = math.tanh %64 : vector<8x128xf32>
    %cst_33 = arith.constant 5.000000e-01 : f32
    %66 = vector.broadcast %cst_33 : f32 to vector<8x128xf32>
    %67 = arith.mulf %66, %65 : vector<8x128xf32>
    %cst_34 = arith.constant 5.000000e-01 : f32
    %68 = vector.broadcast %cst_34 : f32 to vector<8x128xf32>
    %69 = arith.addf %67, %68 : vector<8x128xf32>
    %70 = vector.extract_strided_slice %61 {offsets = [0, 128], sizes = [8, 128], strides = [1, 1]} : vector<8x512xf32> to vector<8x128xf32>
    %cst_35 = arith.constant 5.000000e-01 : f32
    %71 = vector.broadcast %cst_35 : f32 to vector<8x128xf32>
    %72 = arith.mulf %71, %70 : vector<8x128xf32>
    %73 = math.tanh %72 : vector<8x128xf32>
    %cst_36 = arith.constant 5.000000e-01 : f32
    %74 = vector.broadcast %cst_36 : f32 to vector<8x128xf32>
    %75 = arith.mulf %74, %73 : vector<8x128xf32>
    %cst_37 = arith.constant 5.000000e-01 : f32
    %76 = vector.broadcast %cst_37 : f32 to vector<8x128xf32>
    %77 = arith.addf %75, %76 : vector<8x128xf32>
    %78 = vector.extract_strided_slice %61 {offsets = [0, 256], sizes = [8, 128], strides = [1, 1]} : vector<8x512xf32> to vector<8x128xf32>
    %79 = math.tanh %78 : vector<8x128xf32>
    %80 = vector.extract_strided_slice %61 {offsets = [0, 384], sizes = [8, 128], strides = [1, 1]} : vector<8x512xf32> to vector<8x128xf32>
    %cst_38 = arith.constant 5.000000e-01 : f32
    %81 = vector.broadcast %cst_38 : f32 to vector<8x128xf32>
    %82 = arith.mulf %81, %80 : vector<8x128xf32>
    %83 = math.tanh %82 : vector<8x128xf32>
    %cst_39 = arith.constant 5.000000e-01 : f32
    %84 = vector.broadcast %cst_39 : f32 to vector<8x128xf32>
    %85 = arith.mulf %84, %83 : vector<8x128xf32>
    %cst_40 = arith.constant 5.000000e-01 : f32
    %86 = vector.broadcast %cst_40 : f32 to vector<8x128xf32>
    %87 = arith.addf %85, %86 : vector<8x128xf32>
    %88 = arith.mulf %77, %56 : vector<8x128xf32>
    %89 = arith.mulf %69, %79 : vector<8x128xf32>
    %90 = arith.addf %88, %89 : vector<8x128xf32>
    %91 = math.tanh %90 : vector<8x128xf32>
    %92 = arith.mulf %87, %91 : vector<8x128xf32>
    %93 = vector.broadcast %c1_i32 : i32 to vector<8x1xi32>
    %94 = arith.cmpi slt, %93, %0 : vector<8x1xi32>
    %95 = vector.shape_cast %94 : vector<8x1xi1> to vector<8x1xi1>
    %96 = vector.broadcast %95 : vector<8x1xi1> to vector<8x128xi1>
    %97 = arith.select %96, %92, %53 : vector<8x128xi1>, vector<8x128xf32>
    %98 = vector.shape_cast %94 : vector<8x1xi1> to vector<8x1xi1>
    %99 = vector.broadcast %98 : vector<8x1xi1> to vector<8x128xi1>
    %100 = arith.select %99, %90, %56 : vector<8x128xi1>, vector<8x128xf32>
    %c2_i32 = arith.constant 2 : i32
    %101 = arith.index_cast %c2_i32 : i32 to index
    %c0_41 = arith.constant 0 : index
    %c0_42 = arith.constant 0 : index
    %102 = vector.load %arg9[%101, %c0_41, %c0_42] : memref<8x8x512xf32, #tpu.memory_space<vmem>>, vector<1x8x512xf32>
    %103 = vector.shape_cast %102 : vector<1x8x512xf32> to vector<8x512xf32>
    %cst_43 = arith.constant dense<0.000000e+00> : vector<8x512xf32>
    %104 = tpu.matmul %97, %1, %cst_43 {dimension_numbers = #tpu.dot_dimension_numbers<[1], [0], [0], [1], [0, 0, 1, 1], [], []>} : vector<8x128xf32>, vector<128x512xf32>, vector<8x512xf32> -> vector<8x512xf32>
    %105 = arith.addf %103, %104 : vector<8x512xf32>
    %106 = vector.extract_strided_slice %105 {offsets = [0, 0], sizes = [8, 128], strides = [1, 1]} : vector<8x512xf32> to vector<8x128xf32>
    %cst_44 = arith.constant 5.000000e-01 : f32
    %107 = vector.broadcast %cst_44 : f32 to vector<8x128xf32>
    %108 = arith.mulf %107, %106 : vector<8x128xf32>
    %109 = math.tanh %108 : vector<8x128xf32>
    %cst_45 = arith.constant 5.000000e-01 : f32
    %110 = vector.broadcast %cst_45 : f32 to vector<8x128xf32>
    %111 = arith.mulf %110, %109 : vector<8x128xf32>
    %cst_46 = arith.constant 5.000000e-01 : f32
    %112 = vector.broadcast %cst_46 : f32 to vector<8x128xf32>
    %113 = arith.addf %111, %112 : vector<8x128xf32>
    %114 = vector.extract_strided_slice %105 {offsets = [0, 128], sizes = [8, 128], strides = [1, 1]} : vector<8x512xf32> to vector<8x128xf32>
    %cst_47 = arith.constant 5.000000e-01 : f32
    %115 = vector.broadcast %cst_47 : f32 to vector<8x128xf32>
    %116 = arith.mulf %115, %114 : vector<8x128xf32>
    %117 = math.tanh %116 : vector<8x128xf32>
    %cst_48 = arith.constant 5.000000e-01 : f32
    %118 = vector.broadcast %cst_48 : f32 to vector<8x128xf32>
    %119 = arith.mulf %118, %117 : vector<8x128xf32>
    %cst_49 = arith.constant 5.000000e-01 : f32
    %120 = vector.broadcast %cst_49 : f32 to vector<8x128xf32>
    %121 = arith.addf %119, %120 : vector<8x128xf32>
    %122 = vector.extract_strided_slice %105 {offsets = [0, 256], sizes = [8, 128], strides = [1, 1]} : vector<8x512xf32> to vector<8x128xf32>
    %123 = math.tanh %122 : vector<8x128xf32>
    %124 = vector.extract_strided_slice %105 {offsets = [0, 384], sizes = [8, 128], strides = [1, 1]} : vector<8x512xf32> to vector<8x128xf32>
    %cst_50 = arith.constant 5.000000e-01 : f32
    %125 = vector.broadcast %cst_50 : f32 to vector<8x128xf32>
    %126 = arith.mulf %125, %124 : vector<8x128xf32>
    %127 = math.tanh %126 : vector<8x128xf32>
    %cst_51 = arith.constant 5.000000e-01 : f32
    %128 = vector.broadcast %cst_51 : f32 to vector<8x128xf32>
    %129 = arith.mulf %128, %127 : vector<8x128xf32>
    %cst_52 = arith.constant 5.000000e-01 : f32
    %130 = vector.broadcast %cst_52 : f32 to vector<8x128xf32>
    %131 = arith.addf %129, %130 : vector<8x128xf32>
    %132 = arith.mulf %121, %100 : vector<8x128xf32>
    %133 = arith.mulf %113, %123 : vector<8x128xf32>
    %134 = arith.addf %132, %133 : vector<8x128xf32>
    %135 = math.tanh %134 : vector<8x128xf32>
    %136 = arith.mulf %131, %135 : vector<8x128xf32>
    %137 = vector.broadcast %c2_i32 : i32 to vector<8x1xi32>
    %138 = arith.cmpi slt, %137, %0 : vector<8x1xi32>
    %139 = vector.shape_cast %138 : vector<8x1xi1> to vector<8x1xi1>
    %140 = vector.broadcast %139 : vector<8x1xi1> to vector<8x128xi1>
    %141 = arith.select %140, %136, %97 : vector<8x128xi1>, vector<8x128xf32>
    %142 = vector.shape_cast %138 : vector<8x1xi1> to vector<8x1xi1>
    %143 = vector.broadcast %142 : vector<8x1xi1> to vector<8x128xi1>
    %144 = arith.select %143, %134, %100 : vector<8x128xi1>, vector<8x128xf32>
    %c3_i32 = arith.constant 3 : i32
    %145 = arith.index_cast %c3_i32 : i32 to index
    %c0_53 = arith.constant 0 : index
    %c0_54 = arith.constant 0 : index
    %146 = vector.load %arg9[%145, %c0_53, %c0_54] : memref<8x8x512xf32, #tpu.memory_space<vmem>>, vector<1x8x512xf32>
    %147 = vector.shape_cast %146 : vector<1x8x512xf32> to vector<8x512xf32>
    %cst_55 = arith.constant dense<0.000000e+00> : vector<8x512xf32>
    %148 = tpu.matmul %141, %1, %cst_55 {dimension_numbers = #tpu.dot_dimension_numbers<[1], [0], [0], [1], [0, 0, 1, 1], [], []>} : vector<8x128xf32>, vector<128x512xf32>, vector<8x512xf32> -> vector<8x512xf32>
    %149 = arith.addf %147, %148 : vector<8x512xf32>
    %150 = vector.extract_strided_slice %149 {offsets = [0, 0], sizes = [8, 128], strides = [1, 1]} : vector<8x512xf32> to vector<8x128xf32>
    %cst_56 = arith.constant 5.000000e-01 : f32
    %151 = vector.broadcast %cst_56 : f32 to vector<8x128xf32>
    %152 = arith.mulf %151, %150 : vector<8x128xf32>
    %153 = math.tanh %152 : vector<8x128xf32>
    %cst_57 = arith.constant 5.000000e-01 : f32
    %154 = vector.broadcast %cst_57 : f32 to vector<8x128xf32>
    %155 = arith.mulf %154, %153 : vector<8x128xf32>
    %cst_58 = arith.constant 5.000000e-01 : f32
    %156 = vector.broadcast %cst_58 : f32 to vector<8x128xf32>
    %157 = arith.addf %155, %156 : vector<8x128xf32>
    %158 = vector.extract_strided_slice %149 {offsets = [0, 128], sizes = [8, 128], strides = [1, 1]} : vector<8x512xf32> to vector<8x128xf32>
    %cst_59 = arith.constant 5.000000e-01 : f32
    %159 = vector.broadcast %cst_59 : f32 to vector<8x128xf32>
    %160 = arith.mulf %159, %158 : vector<8x128xf32>
    %161 = math.tanh %160 : vector<8x128xf32>
    %cst_60 = arith.constant 5.000000e-01 : f32
    %162 = vector.broadcast %cst_60 : f32 to vector<8x128xf32>
    %163 = arith.mulf %162, %161 : vector<8x128xf32>
    %cst_61 = arith.constant 5.000000e-01 : f32
    %164 = vector.broadcast %cst_61 : f32 to vector<8x128xf32>
    %165 = arith.addf %163, %164 : vector<8x128xf32>
    %166 = vector.extract_strided_slice %149 {offsets = [0, 256], sizes = [8, 128], strides = [1, 1]} : vector<8x512xf32> to vector<8x128xf32>
    %167 = math.tanh %166 : vector<8x128xf32>
    %168 = vector.extract_strided_slice %149 {offsets = [0, 384], sizes = [8, 128], strides = [1, 1]} : vector<8x512xf32> to vector<8x128xf32>
    %cst_62 = arith.constant 5.000000e-01 : f32
    %169 = vector.broadcast %cst_62 : f32 to vector<8x128xf32>
    %170 = arith.mulf %169, %168 : vector<8x128xf32>
    %171 = math.tanh %170 : vector<8x128xf32>
    %cst_63 = arith.constant 5.000000e-01 : f32
    %172 = vector.broadcast %cst_63 : f32 to vector<8x128xf32>
    %173 = arith.mulf %172, %171 : vector<8x128xf32>
    %cst_64 = arith.constant 5.000000e-01 : f32
    %174 = vector.broadcast %cst_64 : f32 to vector<8x128xf32>
    %175 = arith.addf %173, %174 : vector<8x128xf32>
    %176 = arith.mulf %165, %144 : vector<8x128xf32>
    %177 = arith.mulf %157, %167 : vector<8x128xf32>
    %178 = arith.addf %176, %177 : vector<8x128xf32>
    %179 = math.tanh %178 : vector<8x128xf32>
    %180 = arith.mulf %175, %179 : vector<8x128xf32>
    %181 = vector.broadcast %c3_i32 : i32 to vector<8x1xi32>
    %182 = arith.cmpi slt, %181, %0 : vector<8x1xi32>
    %183 = vector.shape_cast %182 : vector<8x1xi1> to vector<8x1xi1>
    %184 = vector.broadcast %183 : vector<8x1xi1> to vector<8x128xi1>
    %185 = arith.select %184, %180, %141 : vector<8x128xi1>, vector<8x128xf32>
    %186 = vector.shape_cast %182 : vector<8x1xi1> to vector<8x1xi1>
    %187 = vector.broadcast %186 : vector<8x1xi1> to vector<8x128xi1>
    %188 = arith.select %187, %178, %144 : vector<8x128xi1>, vector<8x128xf32>
    %c4_i32 = arith.constant 4 : i32
    %189 = arith.index_cast %c4_i32 : i32 to index
    %c0_65 = arith.constant 0 : index
    %c0_66 = arith.constant 0 : index
    %190 = vector.load %arg9[%189, %c0_65, %c0_66] : memref<8x8x512xf32, #tpu.memory_space<vmem>>, vector<1x8x512xf32>
    %191 = vector.shape_cast %190 : vector<1x8x512xf32> to vector<8x512xf32>
    %cst_67 = arith.constant dense<0.000000e+00> : vector<8x512xf32>
    %192 = tpu.matmul %185, %1, %cst_67 {dimension_numbers = #tpu.dot_dimension_numbers<[1], [0], [0], [1], [0, 0, 1, 1], [], []>} : vector<8x128xf32>, vector<128x512xf32>, vector<8x512xf32> -> vector<8x512xf32>
    %193 = arith.addf %191, %192 : vector<8x512xf32>
    %194 = vector.extract_strided_slice %193 {offsets = [0, 0], sizes = [8, 128], strides = [1, 1]} : vector<8x512xf32> to vector<8x128xf32>
    %cst_68 = arith.constant 5.000000e-01 : f32
    %195 = vector.broadcast %cst_68 : f32 to vector<8x128xf32>
    %196 = arith.mulf %195, %194 : vector<8x128xf32>
    %197 = math.tanh %196 : vector<8x128xf32>
    %cst_69 = arith.constant 5.000000e-01 : f32
    %198 = vector.broadcast %cst_69 : f32 to vector<8x128xf32>
    %199 = arith.mulf %198, %197 : vector<8x128xf32>
    %cst_70 = arith.constant 5.000000e-01 : f32
    %200 = vector.broadcast %cst_70 : f32 to vector<8x128xf32>
    %201 = arith.addf %199, %200 : vector<8x128xf32>
    %202 = vector.extract_strided_slice %193 {offsets = [0, 128], sizes = [8, 128], strides = [1, 1]} : vector<8x512xf32> to vector<8x128xf32>
    %cst_71 = arith.constant 5.000000e-01 : f32
    %203 = vector.broadcast %cst_71 : f32 to vector<8x128xf32>
    %204 = arith.mulf %203, %202 : vector<8x128xf32>
    %205 = math.tanh %204 : vector<8x128xf32>
    %cst_72 = arith.constant 5.000000e-01 : f32
    %206 = vector.broadcast %cst_72 : f32 to vector<8x128xf32>
    %207 = arith.mulf %206, %205 : vector<8x128xf32>
    %cst_73 = arith.constant 5.000000e-01 : f32
    %208 = vector.broadcast %cst_73 : f32 to vector<8x128xf32>
    %209 = arith.addf %207, %208 : vector<8x128xf32>
    %210 = vector.extract_strided_slice %193 {offsets = [0, 256], sizes = [8, 128], strides = [1, 1]} : vector<8x512xf32> to vector<8x128xf32>
    %211 = math.tanh %210 : vector<8x128xf32>
    %212 = vector.extract_strided_slice %193 {offsets = [0, 384], sizes = [8, 128], strides = [1, 1]} : vector<8x512xf32> to vector<8x128xf32>
    %cst_74 = arith.constant 5.000000e-01 : f32
    %213 = vector.broadcast %cst_74 : f32 to vector<8x128xf32>
    %214 = arith.mulf %213, %212 : vector<8x128xf32>
    %215 = math.tanh %214 : vector<8x128xf32>
    %cst_75 = arith.constant 5.000000e-01 : f32
    %216 = vector.broadcast %cst_75 : f32 to vector<8x128xf32>
    %217 = arith.mulf %216, %215 : vector<8x128xf32>
    %cst_76 = arith.constant 5.000000e-01 : f32
    %218 = vector.broadcast %cst_76 : f32 to vector<8x128xf32>
    %219 = arith.addf %217, %218 : vector<8x128xf32>
    %220 = arith.mulf %209, %188 : vector<8x128xf32>
    %221 = arith.mulf %201, %211 : vector<8x128xf32>
    %222 = arith.addf %220, %221 : vector<8x128xf32>
    %223 = math.tanh %222 : vector<8x128xf32>
    %224 = arith.mulf %219, %223 : vector<8x128xf32>
    %225 = vector.broadcast %c4_i32 : i32 to vector<8x1xi32>
    %226 = arith.cmpi slt, %225, %0 : vector<8x1xi32>
    %227 = vector.shape_cast %226 : vector<8x1xi1> to vector<8x1xi1>
    %228 = vector.broadcast %227 : vector<8x1xi1> to vector<8x128xi1>
    %229 = arith.select %228, %224, %185 : vector<8x128xi1>, vector<8x128xf32>
    %230 = vector.shape_cast %226 : vector<8x1xi1> to vector<8x1xi1>
    %231 = vector.broadcast %230 : vector<8x1xi1> to vector<8x128xi1>
    %232 = arith.select %231, %222, %188 : vector<8x128xi1>, vector<8x128xf32>
    %c5_i32 = arith.constant 5 : i32
    %233 = arith.index_cast %c5_i32 : i32 to index
    %c0_77 = arith.constant 0 : index
    %c0_78 = arith.constant 0 : index
    %234 = vector.load %arg9[%233, %c0_77, %c0_78] : memref<8x8x512xf32, #tpu.memory_space<vmem>>, vector<1x8x512xf32>
    %235 = vector.shape_cast %234 : vector<1x8x512xf32> to vector<8x512xf32>
    %cst_79 = arith.constant dense<0.000000e+00> : vector<8x512xf32>
    %236 = tpu.matmul %229, %1, %cst_79 {dimension_numbers = #tpu.dot_dimension_numbers<[1], [0], [0], [1], [0, 0, 1, 1], [], []>} : vector<8x128xf32>, vector<128x512xf32>, vector<8x512xf32> -> vector<8x512xf32>
    %237 = arith.addf %235, %236 : vector<8x512xf32>
    %238 = vector.extract_strided_slice %237 {offsets = [0, 0], sizes = [8, 128], strides = [1, 1]} : vector<8x512xf32> to vector<8x128xf32>
    %cst_80 = arith.constant 5.000000e-01 : f32
    %239 = vector.broadcast %cst_80 : f32 to vector<8x128xf32>
    %240 = arith.mulf %239, %238 : vector<8x128xf32>
    %241 = math.tanh %240 : vector<8x128xf32>
    %cst_81 = arith.constant 5.000000e-01 : f32
    %242 = vector.broadcast %cst_81 : f32 to vector<8x128xf32>
    %243 = arith.mulf %242, %241 : vector<8x128xf32>
    %cst_82 = arith.constant 5.000000e-01 : f32
    %244 = vector.broadcast %cst_82 : f32 to vector<8x128xf32>
    %245 = arith.addf %243, %244 : vector<8x128xf32>
    %246 = vector.extract_strided_slice %237 {offsets = [0, 128], sizes = [8, 128], strides = [1, 1]} : vector<8x512xf32> to vector<8x128xf32>
    %cst_83 = arith.constant 5.000000e-01 : f32
    %247 = vector.broadcast %cst_83 : f32 to vector<8x128xf32>
    %248 = arith.mulf %247, %246 : vector<8x128xf32>
    %249 = math.tanh %248 : vector<8x128xf32>
    %cst_84 = arith.constant 5.000000e-01 : f32
    %250 = vector.broadcast %cst_84 : f32 to vector<8x128xf32>
    %251 = arith.mulf %250, %249 : vector<8x128xf32>
    %cst_85 = arith.constant 5.000000e-01 : f32
    %252 = vector.broadcast %cst_85 : f32 to vector<8x128xf32>
    %253 = arith.addf %251, %252 : vector<8x128xf32>
    %254 = vector.extract_strided_slice %237 {offsets = [0, 256], sizes = [8, 128], strides = [1, 1]} : vector<8x512xf32> to vector<8x128xf32>
    %255 = math.tanh %254 : vector<8x128xf32>
    %256 = vector.extract_strided_slice %237 {offsets = [0, 384], sizes = [8, 128], strides = [1, 1]} : vector<8x512xf32> to vector<8x128xf32>
    %cst_86 = arith.constant 5.000000e-01 : f32
    %257 = vector.broadcast %cst_86 : f32 to vector<8x128xf32>
    %258 = arith.mulf %257, %256 : vector<8x128xf32>
    %259 = math.tanh %258 : vector<8x128xf32>
    %cst_87 = arith.constant 5.000000e-01 : f32
    %260 = vector.broadcast %cst_87 : f32 to vector<8x128xf32>
    %261 = arith.mulf %260, %259 : vector<8x128xf32>
    %cst_88 = arith.constant 5.000000e-01 : f32
    %262 = vector.broadcast %cst_88 : f32 to vector<8x128xf32>
    %263 = arith.addf %261, %262 : vector<8x128xf32>
    %264 = arith.mulf %253, %232 : vector<8x128xf32>
    %265 = arith.mulf %245, %255 : vector<8x128xf32>
    %266 = arith.addf %264, %265 : vector<8x128xf32>
    %267 = math.tanh %266 : vector<8x128xf32>
    %268 = arith.mulf %263, %267 : vector<8x128xf32>
    %269 = vector.broadcast %c5_i32 : i32 to vector<8x1xi32>
    %270 = arith.cmpi slt, %269, %0 : vector<8x1xi32>
    %271 = vector.shape_cast %270 : vector<8x1xi1> to vector<8x1xi1>
    %272 = vector.broadcast %271 : vector<8x1xi1> to vector<8x128xi1>
    %273 = arith.select %272, %268, %229 : vector<8x128xi1>, vector<8x128xf32>
    %274 = vector.shape_cast %270 : vector<8x1xi1> to vector<8x1xi1>
    %275 = vector.broadcast %274 : vector<8x1xi1> to vector<8x128xi1>
    %276 = arith.select %275, %266, %232 : vector<8x128xi1>, vector<8x128xf32>
    %c6_i32 = arith.constant 6 : i32
    %277 = arith.index_cast %c6_i32 : i32 to index
    %c0_89 = arith.constant 0 : index
    %c0_90 = arith.constant 0 : index
    %278 = vector.load %arg9[%277, %c0_89, %c0_90] : memref<8x8x512xf32, #tpu.memory_space<vmem>>, vector<1x8x512xf32>
    %279 = vector.shape_cast %278 : vector<1x8x512xf32> to vector<8x512xf32>
    %cst_91 = arith.constant dense<0.000000e+00> : vector<8x512xf32>
    %280 = tpu.matmul %273, %1, %cst_91 {dimension_numbers = #tpu.dot_dimension_numbers<[1], [0], [0], [1], [0, 0, 1, 1], [], []>} : vector<8x128xf32>, vector<128x512xf32>, vector<8x512xf32> -> vector<8x512xf32>
    %281 = arith.addf %279, %280 : vector<8x512xf32>
    %282 = vector.extract_strided_slice %281 {offsets = [0, 0], sizes = [8, 128], strides = [1, 1]} : vector<8x512xf32> to vector<8x128xf32>
    %cst_92 = arith.constant 5.000000e-01 : f32
    %283 = vector.broadcast %cst_92 : f32 to vector<8x128xf32>
    %284 = arith.mulf %283, %282 : vector<8x128xf32>
    %285 = math.tanh %284 : vector<8x128xf32>
    %cst_93 = arith.constant 5.000000e-01 : f32
    %286 = vector.broadcast %cst_93 : f32 to vector<8x128xf32>
    %287 = arith.mulf %286, %285 : vector<8x128xf32>
    %cst_94 = arith.constant 5.000000e-01 : f32
    %288 = vector.broadcast %cst_94 : f32 to vector<8x128xf32>
    %289 = arith.addf %287, %288 : vector<8x128xf32>
    %290 = vector.extract_strided_slice %281 {offsets = [0, 128], sizes = [8, 128], strides = [1, 1]} : vector<8x512xf32> to vector<8x128xf32>
    %cst_95 = arith.constant 5.000000e-01 : f32
    %291 = vector.broadcast %cst_95 : f32 to vector<8x128xf32>
    %292 = arith.mulf %291, %290 : vector<8x128xf32>
    %293 = math.tanh %292 : vector<8x128xf32>
    %cst_96 = arith.constant 5.000000e-01 : f32
    %294 = vector.broadcast %cst_96 : f32 to vector<8x128xf32>
    %295 = arith.mulf %294, %293 : vector<8x128xf32>
    %cst_97 = arith.constant 5.000000e-01 : f32
    %296 = vector.broadcast %cst_97 : f32 to vector<8x128xf32>
    %297 = arith.addf %295, %296 : vector<8x128xf32>
    %298 = vector.extract_strided_slice %281 {offsets = [0, 256], sizes = [8, 128], strides = [1, 1]} : vector<8x512xf32> to vector<8x128xf32>
    %299 = math.tanh %298 : vector<8x128xf32>
    %300 = vector.extract_strided_slice %281 {offsets = [0, 384], sizes = [8, 128], strides = [1, 1]} : vector<8x512xf32> to vector<8x128xf32>
    %cst_98 = arith.constant 5.000000e-01 : f32
    %301 = vector.broadcast %cst_98 : f32 to vector<8x128xf32>
    %302 = arith.mulf %301, %300 : vector<8x128xf32>
    %303 = math.tanh %302 : vector<8x128xf32>
    %cst_99 = arith.constant 5.000000e-01 : f32
    %304 = vector.broadcast %cst_99 : f32 to vector<8x128xf32>
    %305 = arith.mulf %304, %303 : vector<8x128xf32>
    %cst_100 = arith.constant 5.000000e-01 : f32
    %306 = vector.broadcast %cst_100 : f32 to vector<8x128xf32>
    %307 = arith.addf %305, %306 : vector<8x128xf32>
    %308 = arith.mulf %297, %276 : vector<8x128xf32>
    %309 = arith.mulf %289, %299 : vector<8x128xf32>
    %310 = arith.addf %308, %309 : vector<8x128xf32>
    %311 = math.tanh %310 : vector<8x128xf32>
    %312 = arith.mulf %307, %311 : vector<8x128xf32>
    %313 = vector.broadcast %c6_i32 : i32 to vector<8x1xi32>
    %314 = arith.cmpi slt, %313, %0 : vector<8x1xi32>
    %315 = vector.shape_cast %314 : vector<8x1xi1> to vector<8x1xi1>
    %316 = vector.broadcast %315 : vector<8x1xi1> to vector<8x128xi1>
    %317 = arith.select %316, %312, %273 : vector<8x128xi1>, vector<8x128xf32>
    %318 = vector.shape_cast %314 : vector<8x1xi1> to vector<8x1xi1>
    %319 = vector.broadcast %318 : vector<8x1xi1> to vector<8x128xi1>
    %320 = arith.select %319, %310, %276 : vector<8x128xi1>, vector<8x128xf32>
    %c7_i32 = arith.constant 7 : i32
    %321 = arith.index_cast %c7_i32 : i32 to index
    %c0_101 = arith.constant 0 : index
    %c0_102 = arith.constant 0 : index
    %322 = vector.load %arg9[%321, %c0_101, %c0_102] : memref<8x8x512xf32, #tpu.memory_space<vmem>>, vector<1x8x512xf32>
    %323 = vector.shape_cast %322 : vector<1x8x512xf32> to vector<8x512xf32>
    %cst_103 = arith.constant dense<0.000000e+00> : vector<8x512xf32>
    %324 = tpu.matmul %317, %1, %cst_103 {dimension_numbers = #tpu.dot_dimension_numbers<[1], [0], [0], [1], [0, 0, 1, 1], [], []>} : vector<8x128xf32>, vector<128x512xf32>, vector<8x512xf32> -> vector<8x512xf32>
    %325 = arith.addf %323, %324 : vector<8x512xf32>
    %326 = vector.extract_strided_slice %325 {offsets = [0, 0], sizes = [8, 128], strides = [1, 1]} : vector<8x512xf32> to vector<8x128xf32>
    %cst_104 = arith.constant 5.000000e-01 : f32
    %327 = vector.broadcast %cst_104 : f32 to vector<8x128xf32>
    %328 = arith.mulf %327, %326 : vector<8x128xf32>
    %329 = math.tanh %328 : vector<8x128xf32>
    %cst_105 = arith.constant 5.000000e-01 : f32
    %330 = vector.broadcast %cst_105 : f32 to vector<8x128xf32>
    %331 = arith.mulf %330, %329 : vector<8x128xf32>
    %cst_106 = arith.constant 5.000000e-01 : f32
    %332 = vector.broadcast %cst_106 : f32 to vector<8x128xf32>
    %333 = arith.addf %331, %332 : vector<8x128xf32>
    %334 = vector.extract_strided_slice %325 {offsets = [0, 128], sizes = [8, 128], strides = [1, 1]} : vector<8x512xf32> to vector<8x128xf32>
    %cst_107 = arith.constant 5.000000e-01 : f32
    %335 = vector.broadcast %cst_107 : f32 to vector<8x128xf32>
    %336 = arith.mulf %335, %334 : vector<8x128xf32>
    %337 = math.tanh %336 : vector<8x128xf32>
    %cst_108 = arith.constant 5.000000e-01 : f32
    %338 = vector.broadcast %cst_108 : f32 to vector<8x128xf32>
    %339 = arith.mulf %338, %337 : vector<8x128xf32>
    %cst_109 = arith.constant 5.000000e-01 : f32
    %340 = vector.broadcast %cst_109 : f32 to vector<8x128xf32>
    %341 = arith.addf %339, %340 : vector<8x128xf32>
    %342 = vector.extract_strided_slice %325 {offsets = [0, 256], sizes = [8, 128], strides = [1, 1]} : vector<8x512xf32> to vector<8x128xf32>
    %343 = math.tanh %342 : vector<8x128xf32>
    %344 = vector.extract_strided_slice %325 {offsets = [0, 384], sizes = [8, 128], strides = [1, 1]} : vector<8x512xf32> to vector<8x128xf32>
    %cst_110 = arith.constant 5.000000e-01 : f32
    %345 = vector.broadcast %cst_110 : f32 to vector<8x128xf32>
    %346 = arith.mulf %345, %344 : vector<8x128xf32>
    %347 = math.tanh %346 : vector<8x128xf32>
    %cst_111 = arith.constant 5.000000e-01 : f32
    %348 = vector.broadcast %cst_111 : f32 to vector<8x128xf32>
    %349 = arith.mulf %348, %347 : vector<8x128xf32>
    %cst_112 = arith.constant 5.000000e-01 : f32
    %350 = vector.broadcast %cst_112 : f32 to vector<8x128xf32>
    %351 = arith.addf %349, %350 : vector<8x128xf32>
    %352 = arith.mulf %341, %320 : vector<8x128xf32>
    %353 = arith.mulf %333, %343 : vector<8x128xf32>
    %354 = arith.addf %352, %353 : vector<8x128xf32>
    %355 = math.tanh %354 : vector<8x128xf32>
    %356 = arith.mulf %351, %355 : vector<8x128xf32>
    %357 = vector.broadcast %c7_i32 : i32 to vector<8x1xi32>
    %358 = arith.cmpi slt, %357, %0 : vector<8x1xi32>
    %359 = vector.shape_cast %358 : vector<8x1xi1> to vector<8x1xi1>
    %360 = vector.broadcast %359 : vector<8x1xi1> to vector<8x128xi1>
    %361 = arith.select %360, %356, %317 : vector<8x128xi1>, vector<8x128xf32>
    %362 = vector.shape_cast %358 : vector<8x1xi1> to vector<8x1xi1>
    %363 = vector.broadcast %362 : vector<8x1xi1> to vector<8x128xi1>
    %364 = arith.select %363, %354, %320 : vector<8x128xi1>, vector<8x128xf32>
    %c8_i32 = arith.constant 8 : i32
    %c0_113 = arith.constant 0 : index
    %c0_114 = arith.constant 0 : index
    %365 = vector.load %arg8[%c0_113, %c0_114] : memref<8x128xf32, #tpu.memory_space<vmem>>, vector<8x128xf32>
    tpu.vector_store %arg8[%c0_113, %c0_114], %361 {strides = array<i32>} : memref<8x128xf32, #tpu.memory_space<vmem>>, vector<8x128xf32>,
    return
  }
  func.func @transform_0(%arg0: i32) -> (i32, i32, i32) {
    %c0_i32 = arith.constant 0 : i32
    %c0_i32_0 = arith.constant 0 : i32
    %c0_i32_1 = arith.constant 0 : i32
    return %c0_i32, %arg0, %c0_i32_0 : i32, i32, i32
  }
  func.func @transform_1(%arg0: i32) -> (i32, i32) {
    %c0_i32 = arith.constant 0 : i32
    %c0_i32_0 = arith.constant 0 : i32
    return %arg0, %c0_i32 : i32, i32
  }
  func.func @transform_2(%arg0: i32) -> (i32, i32) {
    %c0_i32 = arith.constant 0 : i32
    %c0_i32_0 = arith.constant 0 : i32
    return %arg0, %c0_i32 : i32, i32
  }
  func.func @transform_3(%arg0: i32) -> (i32, i32) {
    %c0_i32 = arith.constant 0 : i32
    %c0_i32_0 = arith.constant 0 : i32
    return %arg0, %c0_i32 : i32, i32
  }
  func.func @transform_4(%arg0: i32) -> (i32, i32) {
    %c0_i32 = arith.constant 0 : i32
    %c0_i32_0 = arith.constant 0 : i32
    %c0_i32_1 = arith.constant 0 : i32
    return %c0_i32, %c0_i32_0 : i32, i32
  }
  func.func @transform_5(%arg0: i32) -> (i32, i32) {
    %c0_i32 = arith.constant 0 : i32
    %c0_i32_0 = arith.constant 0 : i32
    %c0_i32_1 = arith.constant 0 : i32
    return %c0_i32, %c0_i32_0 : i32, i32
  }
  func.func @transform_6(%arg0: i32) -> (i32, i32) {
    %c0_i32 = arith.constant 0 : i32
    %c0_i32_0 = arith.constant 0 : i32
    %c0_i32_1 = arith.constant 0 : i32
    return %c0_i32, %c0_i32_0 : i32, i32
  }
  func.func @transform_7(%arg0: i32) -> (i32, i32) {
    %c0_i32 = arith.constant 0 : i32
    %c0_i32_0 = arith.constant 0 : i32
    return %arg0, %c0_i32 : i32, i32
  }
}

</mosaic_0001>

<bundles_post_ra>
// kernel: tpu_custom_call.1
= control target key start
LH: loop header
LB: loop body
LE: loop exit
PB: predicated region body
PF: predicated region fallthrough
CT: control target
= control target key end

     0   :  { %s4186_s0 = inlined_call_operand.hbm [shape: f32[8,16,32], index: 0, kind: input, shape index: {}]   ;;  %s4187_s1 = inlined_call_operand.vmem [shape: s32[16,1], index: 1, kind: input, shape index: {}]   ;;  %s4188_s2 = inlined_call_operand.vmem [shape: f32[16,128], index: 2, kind: input, shape index: {}]   ;;  %s4189_s3 = inlined_call_operand.hbm [shape: f32[16,128], index: 3, kind: input, shape index: {}]   ;;  %s4190_s4 = inlined_call_operand.hbm [shape: f32[32,512], index: 4, kind: input, shape index: {}]   ;;  %s4191_s5 = inlined_call_operand.hbm [shape: f32[128,512], index: 5, kind: input, shape index: {}]   ;;  %s4192_s6 = inlined_call_operand.vmem [shape: f32[1,512], index: 6, kind: input, shape index: {}]   ;;  %s4193_s7 = inlined_call_operand.hbm [shape: f32[16,128], index: 7, kind: output, shape index: {}]  }
   0x1   :  { %4202 = sst [smem:[#allocation20_spill]] %s4186_s0 }
   0x2   :  { %4203 = sst [smem:[#allocation21_spill]] %s4190_s4 }
   0x3   :  { %4204 = sst [smem:[#allocation22_spill]] %s4191_s5 }
   0x4   :  { %12 = vsyncpa [#allocation4], 0 }
   0x5   :  { %14 = vsyncpa [#allocation4 + $0x1], 0 }
   0x6   :  { %15 = vsyncpa [#allocation7], 0 }
   0x7   :  { %17 = vsyncpa [#allocation7 + $0x1], 0 }
   0x8   :  { %18 = vsyncpa [#allocation10], 0 }
   0x9   :  { %19 = vsyncpa [#allocation5], 0 }
   0xa   :  { %21 = vsyncpa [#allocation5 + $0x1], 0  ;;  %s3395_s24 = smov 0   ;;  %s3397_s25 = smov 0  }
   0xb   :  { %s3399_s26 = smov 0   ;;  %s3401_s27 = smov 0  }
   0xc LB: > { %4205 = sst [smem:[#allocation17_spill]] %s3337_s26  ;;  %s3416_s28 = sadd.s32 4294967295, %s3341_s27   ;;  %s3341_s27 = sphi %s3401_s27, %s4230_s27   ;;  %s3337_s26 = sphi %s3399_s26, %s4232_s26   ;;  %s3333_s25 = sphi %s3397_s25, %s4234_s25   ;;  %s3329_s24 = sphi %s3395_s24, %s4233_s24  }
   0xd   : > { %s2357_s29 = sadd.s32 4294967294, %s3341_s27   ;;  %s3420_s30 = sadd.s32 1, %s3341_s27  }
   0xe   : > { %4206 = sst [smem:[#allocation18_spill]] %s3420_s30  ;;  %s34_s8 = sadd.s32 1, %s3337_s26 }
   0xf   : > { %s31_s9 = ssub.s32 %s3341_s27, %s3420_s30  ;;  %p41_p0 = scmp.ne.s32.totalorder %s3337_s26, %s3333_s25 }
  0x10   : > { %p32_p1 = scmp.eq.s32.totalorder %s31_s9, 0  ;;  %p42_p2 = scmp.eq.s32.totalorder %s3341_s27, 0 }
  0x11   : > { %p47_p3 = scmp.ne.s32.totalorder %s3333_s25, %s3329_s24  ;;  %p4194_p4 = scmp.eq.s32.totalorder %s3416_s28, 0 }
  0x12   : > { %s3432_s10 = scalar_select %p32_p1, %s3337_s26, %s34_s8  }
  0x13   : > { %p3434_p5 = por %p42_p2, %p41_p0  ;;  %p3440_p6 = por %p4194_p4, %p47_p3 }
  0x14   : > { %4207 = sst [smem:[#allocation19_spill]] %s3432_s10  ;;  %p212_p7 = scmp.eq.s32.totalorder %s3416_s28, 1 }
  0x15   : > { %s4208_s11 = scalar_select %p3434_p5, 1, 0 }
  0x16   : > { %s4209_s12 = scalar_select %p3440_p6, 1, 0 }
  0x17   : > { %p218_p8 = scmp.eq.s32.totalorder %s2357_s29, 1  ;;  %p2358_p9 = scmp.ge.s32.totalorder %s3341_s27, 1 }
  0x18   : > { %p225_p10 = scmp.lt.s32.totalorder %s3341_s27, 3  ;;  %p3447_p11 = por %p212_p7, %p41_p0 }
  0x19   : > { %p3451_p12 = por %p218_p8, %p47_p3  ;;  %s3343_s16 = smov [#allocation8]  }
  0x1a   : > { %s4210_s13 = scalar_select %p3447_p11, 1, 0 }
  0x1b   : > { %s4211_s14 = scalar_select %p3451_p12, 1, 0 }
  0x1c   : > { %p3455_p13 = pnand %p2358_p9, %p225_p10  ;;  %s237_s17 = sshll.u32 %s3343_s16, 4  ;;  %s238_s17 = int_to_ptr.vmem [resolvable:$true] %s237_s17 }
  0x1d   : > { %s3344_s19 = smov [#allocation9]   ;;  %s4214_s4 = sld [smem:[#allocation21_spill]] }
  0x1e   : > { %s4212_s15 = scalar_select %p3455_p13, 1, 0 }
  0x1f   : > { %p3000_p1 = pneg %p3455_p13  ;;  %s250_s20 = sshll.u32 %s3344_s19, 4  ;;  %s251_s20 = int_to_ptr.vmem [resolvable:$true] %s250_s20 }
  0x21   : > { %p3463_p2 = pnand %p3000_p1, %p4194_p4 }
  0x23   : > { %s3147_s23 = scalar_lea.hbm %s4214_s4, 2048  ;;  %p3149_p8 = pneg %p3463_p2 }
  0x24   : > { %p3148_p7 = scmp.ne.s32.totalorder %s4214_s4, %s3147_s23  ;;  %p3154_p1 = scmp.lt.u32.totalorder %s3147_s23, %s4214_s4 }
  0x26   : > { %p3150_p9 = pnand %p3149_p8, %p3148_p7 }
  0x28   : > { %p3151_p10 = pneg %p3150_p9 }
  0x2a   : > { %p3156_p0 = pnand %p3154_p1, %p3151_p10 }
  0x2c   : > { %3159 = shalt.err (!%p3156_p0)
}
  0x2d   : > { %s3160_s19 = scalar_lea.vmem %s238_s17, 2048  ;;  %p3168_p11 = scmp.lt.s32.totalorder %s238_s17, %s238_s17 }
  0x2e   : > { %p3161_p4 = scmp.ne.s32.totalorder %s238_s17, %s3160_s19  ;;  %p3169_p6 = scmp.lt.s32.totalorder %s3160_s19, %s3160_s19 }
  0x30   : > { %p3163_p3 = pnand %p3161_p4, %p3149_p8  ;;  %p3170_p13 = por %p3169_p6, %p3168_p11 }
  0x32   : > { %p3164_p12 = pneg %p3163_p3 }
  0x34   : > { %p3171_p5 = pnand %p3170_p13, %p3164_p12 }
  0x36   : > { %3174 = shalt.err (!%p3171_p5)
}
  0x37   : > { %s3345_s21 = smov 512   ;;  %s3346_s22 = smov 32  }
  0x38   : > { %3003 = dma.hbm_to_vmem [thread:$0]  (!%p3463_p2), %s4214_s4, 2048, %s238_s17, [#allocation7], %s3345_s21, %s3345_s21, %s3346_s22  }
  0x39   : > { %p4215_p0 = scmp.ne.s32.totalorder %s4208_s11, 0  ;;  %p4216_p7 = scmp.lt.s32.totalorder %s3341_s27, 2 }
  0x3a   : > { %s4218_s5 = sld [smem:[#allocation22_spill]] }
  0x3b   : > { %p3495_p4 = pnand %p4216_p7, %p4215_p0 }
  0x3d   : > { %s4217_s8 = scalar_select %p3495_p4, 1, 0 }
  0x40   : > { %s3175_s19 = scalar_lea.hbm %s4218_s5, 8192 }
  0x41   : > { %p3176_p5 = scmp.ne.s32.totalorder %s4218_s5, %s3175_s19  ;;  %p3182_p12 = scmp.lt.u32.totalorder %s3175_s19, %s4218_s5 }
  0x43   : > { %p3178_p6 = pnand %p3176_p5, %p3149_p8 }
  0x45   : > { %p3179_p11 = pneg %p3178_p6 }
  0x47   : > { %p3184_p13 = pnand %p3182_p12, %p3179_p11 }
  0x49   : > { %3187 = shalt.err (!%p3184_p13)
}
  0x4a   : > { %s3188_s23 = scalar_lea.vmem %s251_s20, 8192  ;;  %p3196_p1 = scmp.lt.s32.totalorder %s251_s20, %s251_s20 }
  0x4b   : > { %p3189_p3 = scmp.ne.s32.totalorder %s251_s20, %s3188_s23  ;;  %p3197_p0 = scmp.lt.s32.totalorder %s3188_s23, %s3188_s23 }
  0x4d   : > { %p3191_p9 = pnand %p3189_p3, %p3149_p8  ;;  %p3198_p7 = por %p3197_p0, %p3196_p1 }
  0x4f   : > { %p3192_p10 = pneg %p3191_p9 }
  0x51   : > { %p3199_p4 = pnand %p3198_p7, %p3192_p10 }
  0x53   : > { %3202 = shalt.err (!%p3199_p4)
}
  0x54   : > { %3006 = dma.hbm_to_vmem [thread:$0]  (!%p3463_p2), %s4218_s5, 8192, %s251_s20, [#allocation10], %s3345_s21, %s3345_s21, %s3346_s22  }
  0x55   : > { %s3520_s29 = sand.u32 1, %s3337_s26   ;;  %s2363_s16 = sshll.u32 %s3341_s27, 7 }
  0x56   : > { %s2362_s9 = sshll.u32 %s3520_s29, 6  ;;  %s4219_s0 = sld [smem:[#allocation20_spill]] }
  0x57   : > { %s271_s11 = scalar_lea.vmem [#allocation3], %s2362_s9  ;;  %s268_s20 = scalar_lea.sflag [#allocation4], %s3520_s29 }
  0x58   : > { %s277_s23 = sshll.u32 %s271_s11, 4  ;;  %p4220_p8 = scmp.ne.s32.totalorder %s4217_s8, 0  ;;  %s3531_s23 = int_to_ptr.vmem [resolvable:$true] %s277_s23 }
  0x5a   : > { %p3205_p4 = pneg %p4220_p8 }
  0x5c   : > { %s3529_s18 = scalar_lea.hbm %s4219_s0, %s2363_s16  ;;  %s3208_s10 = scalar_lea.hbm %s4219_s0, 2048 }
  0x5d   : > { %s3203_s21 = scalar_lea.hbm %s3529_s18, 1024  ;;  %p3209_p11 = scmp.lt.u32.totalorder %s3529_s18, %s4219_s0 }
  0x5e   : > { %p3204_p2 = scmp.ne.s32.totalorder %s3529_s18, %s3203_s21  ;;  %p3210_p12 = scmp.lt.u32.totalorder %s3208_s10, %s3203_s21 }
  0x5f   : > { %p3212_p3 = scmp.lt.u32.totalorder %s3203_s21, %s3529_s18 }
  0x60   : > { %p3206_p5 = pnand %p3205_p4, %p3204_p2  ;;  %p3211_p13 = por %p3210_p12, %p3209_p11 }
  0x62   : > { %p3207_p6 = pneg %p3206_p5  ;;  %p3213_p9 = por %p3212_p3, %p3211_p13 }
  0x64   : > { %p3214_p10 = pnand %p3213_p9, %p3207_p6 }
  0x66   : > { %3217 = shalt.err (!%p3214_p10)
}
  0x67   : > { %s3218_s9 = scalar_lea.vmem %s3531_s23, 1024  ;;  %s3347_s11 = smov [#allocation3]  }
  0x68   : > { %p3219_p1 = scmp.ne.s32.totalorder %s3531_s23, %s3218_s9  ;;  %s3223_s22 = sshll.u32 %s3347_s11, 4  ;;  %s3224_s22 = int_to_ptr.vmem [resolvable:$false] %s3223_s22 }
  0x69   : > { %s3225_s30 = scalar_lea.vmem %s3224_s22, 2048  ;;  %p3226_p2 = scmp.lt.s32.totalorder %s3531_s23, %s3224_s22 }
  0x6a   : > { %p3221_p0 = pnand %p3219_p1, %p3205_p4  ;;  %p3227_p5 = scmp.lt.s32.totalorder %s3225_s30, %s3218_s9 }
  0x6c   : > { %p3222_p7 = pneg %p3221_p0  ;;  %p3228_p11 = por %p3227_p5, %p3226_p2 }
  0x6e   : > { %p3229_p12 = pnand %p3228_p11, %p3222_p7 }
  0x70   : > { %3232 = shalt.err (!%p3229_p12)
}
  0x71   : > { %s3348_s21 = smov 256   ;;  %s3349_s10 = smov 128  }
  0x72   : > { %s3350_s19 = smov 8   ;;  %s301_s17 = sand.u32 1, %s3341_s27  }
  0x73   : > { %3010 = dma.hbm_to_vmem [thread:$0]  (!%p4220_p8), %s3529_s18, 1024, %s3531_s23, %s268_s20, %s3348_s21, %s3349_s10, %s3350_s19  }
  0x74   : > { %s2364_s11 = sshll.u32 %s3520_s29, 3  ;;  %s3568_s30 = scalar_lea.hbm %s4189_s3, %s2363_s16 }
  0x75   : > { %s305_s0 = scalar_lea.vmem [#allocation6], %s2364_s11  ;;  %s302_s5 = scalar_lea.sflag [#allocation7], %s301_s17 }
  0x76   : > { %s312_s4 = sshll.u32 %s305_s0, 4  ;;  %s3233_s26 = scalar_lea.hbm %s3568_s30, 128  ;;  %s313_s4 = int_to_ptr.vmem [resolvable:$true] %s312_s4 }
  0x77   : > { %p3234_p6 = scmp.ne.s32.totalorder %s3568_s30, %s3233_s26  ;;  %s3238_s23 = scalar_lea.hbm %s4189_s3, 256 }
  0x78   : > { %p3239_p9 = scmp.lt.u32.totalorder %s3568_s30, %s4189_s3  ;;  %p3240_p10 = scmp.lt.u32.totalorder %s3238_s23, %s3233_s26 }
  0x79   : > { %p3236_p13 = pnand %p3234_p6, %p3205_p4  ;;  %p3242_p0 = scmp.lt.u32.totalorder %s3233_s26, %s3568_s30 }
  0x7a   : > { %p3241_p1 = por %p3240_p10, %p3239_p9 }
  0x7b   : > { %p3237_p3 = pneg %p3236_p13 }
  0x7c   : > { %p3243_p7 = por %p3242_p0, %p3241_p1 }
  0x7e   : > { %p3244_p2 = pnand %p3243_p7, %p3237_p3 }
  0x80   : > { %3247 = shalt.err (!%p3244_p2)
}
  0x81   : > { %s3248_s0 = scalar_lea.vmem %s313_s4, 128  ;;  %s3351_s21 = smov [#allocation6]  }
  0x82   : > { %p3249_p5 = scmp.ne.s32.totalorder %s313_s4, %s3248_s0  ;;  %s3253_s10 = sshll.u32 %s3351_s21, 4  ;;  %s3254_s10 = int_to_ptr.vmem [resolvable:$false] %s3253_s10 }
  0x83   : > { %s3255_s19 = scalar_lea.vmem %s3254_s10, 256  ;;  %p3256_p6 = scmp.lt.s32.totalorder %s313_s4, %s3254_s10 }
  0x84   : > { %p3251_p11 = pnand %p3249_p5, %p3205_p4  ;;  %p3257_p13 = scmp.lt.s32.totalorder %s3255_s19, %s3248_s0 }
  0x86   : > { %p3252_p12 = pneg %p3251_p11  ;;  %p3258_p9 = por %p3257_p13, %p3256_p6 }
  0x88   : > { %p3259_p10 = pnand %p3258_p9, %p3252_p12 }
  0x8a   : > { %3262 = shalt.err (!%p3259_p10)
}
  0x8b   : > { %3013 = dma.hbm_to_vmem [thread:$0]  (!%p4220_p8), %s3568_s30, 128, %s313_s4, %s302_s5  }
  0x8c   : > { %p4221_p3 = scmp.ne.s32.totalorder %s4212_s15, 0 }
  0x8d   : > { %s3592_s26 = sand.u32 (!%p4221_p3), 1, %s3333_s25   ;;  %p4222_p4 = scmp.ne.s32.totalorder (!%p4221_p3), %s4209_s12, 0 }
  0x8e   : > { %321 = sbr.rel (%p4221_p3) target bundleno = 2218 (0x8aa), region = 48  ;;  %s2367_s17 = sshll.u32 (!%p4221_p3), %s3592_s26, 6 }
  0x8f   : > { %s324_s11 = scalar_lea.sflag (!%p4221_p3), [#allocation4], %s3592_s26  ;;  %s3596_s9 = scalar_lea.vmem (!%p4221_p3), [#allocation3], %s2367_s17 }
  0x95   : > { %3308 = dma.done.wait (%p4222_p4), %s324_s11, 1024  }
  0x96   : > { %3310 = vsyncadd (%p4222_p4), %s324_s11, 4294966272  ;;  %s332_s4 = sand.u32 1, %s3416_s28   ;;  %s2368_s5 = sshll.u32 %s3592_s26, 3 }
  0x97   : > { %s333_s15 = scalar_lea.sflag [#allocation7], %s332_s4  ;;  %s3606_s8 = scalar_lea.vmem [#allocation6], %s2368_s5 }
  0x98   : > { %3312 = dma.done.wait (%p4222_p4), %s333_s15, 128  }
  0x99   : > { %3314 = vsyncadd (%p4222_p4), %s333_s15, 4294967168  ;;  %p4223_p8 = scmp.eq.s32.totalorder %s3416_s28, 0 }
  0x9b   : > { %3316 = dma.done.wait (%p4223_p8), [#allocation7], 2048   ;;  %p4224_p1 = pmov %p4223_p8 }
  0x9d   : > { %3318 = vsyncadd (%p4224_p1), [#allocation7], 4294965248  ;;  %p4225_p0 = pmov %p4224_p1 }
  0x9f   : > { %3320 = dma.done.wait (%p4225_p0), [#allocation10], 8192   ;;  %p4226_p7 = pmov %p4225_p0 }
  0xa0   : > { %v3352_v0 = vmov 0.0   ;;  %v3353_v1 = vmov 0   ;;  %v470_v2 = vld [vmem:[#allocation8 + $0x8] sm:$0xff]  ;;  %v472_v4 = vld [vmem:[#allocation8 + $0x18] sm:$0xff]  ;;  %v469_v7 = vld [vmem:[#allocation8] sm:$0xff]  ;;  %vm507_vm0 = vcmask 261120  }
  0xa1   : > { %3322 = vsyncadd (%p4226_p7), [#allocation10], 4294959104  ;;  %596 = vmatprep.mubr.f32.mxu0 %v3352_v0  ;;  %709 = vmatprep.mubr.f32.mxu1 %v3352_v0  ;;  %v474_v3 = vld [vmem:[#allocation8 + $0x28] sm:$0xff]  ;;  %v476_v6 = vld [vmem:[#allocation8 + $0x38] sm:$0xff]  ;;  %p388_p2 = scmp.lt.s32.totalorder %s3416_s28, 1  ;;  %s2391_s10 = sshll.u32 %s3416_s28, 7 }
  0xa2   : > { %3065 = vset.pattern.permute.xlu0 %v3353_v1  ;;  %3066 = vset.pattern.permute.xlu1 %v3353_v1  ;;  %v2394_v5 = vpack.c.bf16 %v474_v3, %v470_v2  ;;  %v473_v8 = vld [vmem:[#allocation8 + $0x20] sm:$0xff]  ;;  %v2402_v9 = vpack.c.bf16 %v476_v6, %v472_v4  ;;  %v471_v11 = vld [vmem:[#allocation8 + $0x10] sm:$0xff]  ;;  %v478_v13 = vld [vmem:[#allocation8 + $0x48] sm:$0xff]  ;;  %s387_s19 = scalar_lea.vmem [#allocation11], %s2368_s5  ;;  %s4142_s4 = scalar_lea.hbm %s4193_s7, %s2391_s10 }
  0xa3   : > { %v2396_v10 = vpack.c.bf16 %v473_v8, %v469_v7  ;;  %v475_v12 = vld [vmem:[#allocation8 + $0x30] sm:$0xff]  ;;  %v482_v15 = vld [vmem:[#allocation8 + $0x68] sm:$0xff]  ;;  %v480_v16 = vld [vmem:[#allocation8 + $0x58] sm:$0xff]  ;;  %s3704_s12 = scalar_select %p388_p2, %s3416_s28, 1 }
  0xa4   : > { %2395 = vmatprep.subr.bf16.mxu0 %v2394_v5  ;;  %v2404_v14 = vpack.c.bf16 %v475_v12, %v471_v11  ;;  %v484_v17 = vld [vmem:[#allocation8 + $0x78] sm:$0xff]  ;;  %2403 = vmatprep.subr.bf16.mxu1 %v2402_v9  ;;  %v2398_v18 = vpack.c.bf16 %v482_v15, %v478_v13  ;;  %v477_v20 = vld [vmem:[#allocation8 + $0x40] sm:$0xff]  ;;  %v479_v22 = vld [vmem:[#allocation8 + $0x50] sm:$0xff]  ;;  %s2221_s17 = sshll.u32 %s387_s19, 4  ;;  %s2208_s15 = scalar_lea.sflag [#allocation5], %s3592_s26  ;;  %s4144_s17 = int_to_ptr.vmem [resolvable:$true] %s2221_s17 }
  0xa5   : > { %2397 = vmatpush1.bf16.msra.mxu0 %v2396_v10  ;;  %v2406_v19 = vpack.c.bf16 %v484_v17, %v480_v16  ;;  %v481_v21 = vld [vmem:[#allocation8 + $0x60] sm:$0xff]  ;;  %v483_v24 = vld [vmem:[#allocation8 + $0x70] sm:$0xff]  ;;  %v398_v25 = vld [vmem:[#allocation9 + $0x8] sm:$0xff]  ;;  %s2372_s22 = sshll.u32 %s3704_s12, 3  ;;  %s3263_s28 = scalar_lea.vmem %s4144_s17, 128 }
  0xa6   : > { %2405 = vmatpush1.bf16.msra.mxu1 %v2404_v14  ;;  %v2400_v23 = vpack.c.bf16 %v481_v21, %v477_v20  ;;  %2399 = vmatprep.subr.bf16.mxu0 %v2398_v18  ;;  %v2408_v26 = vpack.c.bf16 %v483_v24, %v479_v22  ;;  %v402_v27 = vld [vmem:[#allocation9 + $0x28] sm:$0xff]  ;;  %v400_v28 = vld [vmem:[#allocation9 + $0x18] sm:$0xff]  ;;  %v397_v32 = vld [vmem:[#allocation9] sm:$0xff]  ;;  %s391_s18 = scalar_lea.vmem %s4187_s1, %s2372_s22  ;;  %s395_s20 = scalar_lea.vmem %s4188_s2, %s2372_s22 }
  0xa7   : > { %2407 = vmatprep.subr.bf16.mxu1 %v2406_v19  ;;  %v404_v29 = vld [vmem:[#allocation9 + $0x38] sm:$0xff]  ;;  %v3624_v30 = vpack.c.bf16 %v402_v27, %v398_v25  ;;  %v401_v33 = vld [vmem:[#allocation9 + $0x20] sm:$0xff]  ;;  %v399_v34 = vld [vmem:[#allocation9 + $0x10] sm:$0xff]  ;;  %p3264_p5 = scmp.ne.s32.totalorder %s4144_s17, %s3263_s28  ;;  %p4227_p11 = scmp.ne.s32.totalorder %s4210_s13, 0 }
  0xa8   : > { %v3626_v31 = vpack.c.bf16 %v404_v29, %v400_v28  ;;  %v461_v35 = vld [vmem:[%s3596_s9] sm:$0xff]  ;;  %v3629_v36 = vpack.c.bf16 %v401_v33, %v397_v32  ;;  %v406_v38 = vld [vmem:[#allocation9 + $0x48] sm:$0xff]  ;;  %v408_v41 = vld [vmem:[#allocation9 + $0x58] sm:$0xff]  ;;  %s3354_s5 = smov [#allocation11]  }
  0xa9   : > { %2401 = vmatpush1.bf16.msra.mxu0 %v2400_v23  ;;  %v403_v37 = vld [vmem:[#allocation9 + $0x30] sm:$0xff]  ;;  %v410_v40 = vld [vmem:[#allocation9 + $0x68] sm:$0xff]  ;;  %v412_v42 = vld [vmem:[#allocation9 + $0x78] sm:$0xff]  ;;  %p3265_p12 = pnand %p3264_p5, %p4227_p11 }
  0xaa   : > { %2409 = vmatpush1.bf16.msra.mxu1 %v2408_v26  ;;  %2411 = vmatprep.subr.bf16.mxu0 %v3624_v30  ;;  %v3632_v39 = vpack.c.bf16 %v403_v37, %v399_v34  ;;  %v3635_v43 = vpack.c.bf16 %v410_v40, %v406_v38  ;;  %v405_v44 = vld [vmem:[#allocation9 + $0x40] sm:$0xff]  ;;  %v407_v46 = vld [vmem:[#allocation9 + $0x50] sm:$0xff]  ;;  %v462_v47 = vld [vmem:[%s3596_s9 + $0x8] sm:$0xff]  ;;  %v3639_v48 = vpack.c.bf16 %v412_v42, %v408_v41 }
  0xab   : > { %2443 = vmatprep.subr.bf16.mxu1 %v3626_v31  ;;  %v409_v45 = vld [vmem:[#allocation9 + $0x60] sm:$0xff]  ;;  %v411_v49 = vld [vmem:[#allocation9 + $0x70] sm:$0xff]  ;;  %v414_v50 = vld [vmem:[#allocation9 + $0x88] sm:$0xff]  ;;  %p3266_p6 = pneg %p3265_p12 }
  0xac   : > { %2374 = vmatmul.mubr.msk.f32.vlgmr.msra.gmra.mrb[0].mxu0 %vm507_vm0, %v461_v35  ;;  %v3643_v51 = vpack.c.bf16 %v409_v45, %v405_v44  ;;  %v418_v52 = vld [vmem:[#allocation9 + $0xa8] sm:$0xff]  ;;  %v416_v53 = vld [vmem:[#allocation9 + $0x98] sm:$0xff]  ;;  %v3647_v55 = vpack.c.bf16 %v411_v49, %v407_v46  ;;  %v413_v56 = vld [vmem:[#allocation9 + $0x80] sm:$0xff] }
  0xad   : > { %2382 = vmatmul.mubr.msk.f32.vlgmr.msra.gmra.mrb[0].mxu1 %vm507_vm0, %v461_v35  ;;  %2413 = vmatpush1.bf16.msra.mxu0 %v3629_v36  ;;  %v420_v54 = vld [vmem:[#allocation9 + $0xb8] sm:$0xff]  ;;  %v417_v57 = vld [vmem:[#allocation9 + $0xa0] sm:$0xff]  ;;  %v3651_v58 = vpack.c.bf16 %v418_v52, %v414_v50  ;;  %v415_v59 = vld [vmem:[#allocation9 + $0x90] sm:$0xff] }
  0xae   : > { %2445 = vmatpush1.bf16.msra.mxu1 %v3632_v39  ;;  %602 = vmatprep.mubr.f32.mxu0 %v3352_v0  ;;  %v419_v60 = vld [vmem:[#allocation9 + $0xb0] sm:$0xff]  ;;  %v3655_v61 = vpack.c.bf16 %v420_v54, %v416_v53  ;;  %v422_v62 = vld [vmem:[#allocation9 + $0xc8] sm:$0xff]  ;;  %v463_v2 = vld [vmem:[%s3596_s9 + $0x10] sm:$0xff]  ;;  %v3660_v3 = vpack.c.bf16 %v417_v57, %v413_v56 }
  0xaf   : > { %715 = vmatprep.mubr.f32.mxu1 %v3352_v0  ;;  %2415 = vmatprep.subr.bf16.mxu0 %v3635_v43  ;;  %v426_v63 = vld [vmem:[#allocation9 + $0xe8] sm:$0xff]  ;;  %v424_v4 = vld [vmem:[#allocation9 + $0xd8] sm:$0xff]  ;;  %v3664_v6 = vpack.c.bf16 %v419_v60, %v415_v59  ;;  %v421_v7 = vld [vmem:[#allocation9 + $0xc0] sm:$0xff] }
  0xb0   : > { %2375 = vmatmul.mubr.msk.f32.gmra.mrb[2].mxu0 %vm507_vm0, %v462_v47  ;;  %2447 = vmatprep.subr.bf16.mxu1 %v3639_v48  ;;  %v428_v5 = vld [vmem:[#allocation9 + $0xf8] sm:$0xff]  ;;  %v425_v8 = vld [vmem:[#allocation9 + $0xe0] sm:$0xff]  ;;  %v3668_v9 = vpack.c.bf16 %v426_v63, %v422_v62  ;;  %v423_v10 = vld [vmem:[#allocation9 + $0xd0] sm:$0xff] }
  0xb1   : > { %2383 = vmatmul.mubr.msk.f32.gmra.mrb[2].mxu1 %vm507_vm0, %v462_v47  ;;  %2417 = vmatpush1.bf16.msra.mxu0 %v3643_v51  ;;  %v427_v11 = vld [vmem:[#allocation9 + $0xf0] sm:$0xff]  ;;  %v3672_v12 = vpack.c.bf16 %v428_v5, %v424_v4  ;;  %v430_v13 = vld [vmem:[#allocation9 + $0x108] sm:$0xff]  ;;  %v3677_v16 = vpack.c.bf16 %v425_v8, %v421_v7  ;;  %v432_v17 = vld [vmem:[#allocation9 + $0x118] sm:$0xff] }
  0xb2   : > { %2449 = vmatpush1.bf16.msra.mxu1 %v3647_v55  ;;  %608 = vmatprep.mubr.f32.mxu0 %v3352_v0  ;;  %v434_v14 = vld [vmem:[#allocation9 + $0x128] sm:$0xff]  ;;  %v436_v18 = vld [vmem:[#allocation9 + $0x138] sm:$0xff]  ;;  %v3681_v19 = vpack.c.bf16 %v427_v11, %v423_v10  ;;  %v429_v20 = vld [vmem:[#allocation9 + $0x100] sm:$0xff] }
  0xb3   : > { %721 = vmatprep.mubr.f32.mxu1 %v3352_v0  ;;  %2419 = vmatprep.subr.bf16.mxu0 %v3651_v58  ;;  %v464_v15 = vld [vmem:[%s3596_s9 + $0x18] sm:$0xff]  ;;  %v433_v21 = vld [vmem:[#allocation9 + $0x120] sm:$0xff]  ;;  %v3686_v22 = vpack.c.bf16 %v434_v14, %v430_v13  ;;  %v431_v23 = vld [vmem:[#allocation9 + $0x110] sm:$0xff]  ;;  %v3690_v25 = vpack.c.bf16 %v436_v18, %v432_v17 }
  0xb4   : > { %2376 = vmatmul.mubr.msk.f32.gmra.mrb[4].mxu0 %vm507_vm0, %v463_v2  ;;  %2451 = vmatprep.subr.bf16.mxu1 %v3655_v61  ;;  %v435_v24 = vld [vmem:[#allocation9 + $0x130] sm:$0xff]  ;;  %v438_v26 = vld [vmem:[#allocation9 + $0x148] sm:$0xff]  ;;  %v3695_v29 = vpack.c.bf16 %v433_v21, %v429_v20  ;;  %v440_v32 = vld [vmem:[#allocation9 + $0x158] sm:$0xff] }
  0xb5   : > { %2384 = vmatmul.mubr.msk.f32.gmra.mrb[4].mxu1 %vm507_vm0, %v463_v2  ;;  %2421 = vmatpush1.bf16.msra.mxu0 %v3660_v3  ;;  %v442_v27 = vld [vmem:[#allocation9 + $0x168] sm:$0xff]  ;;  %v465_v28 = vld [vmem:[%s3596_s9 + $0x20] sm:$0xff]  ;;  %v444_v33 = vld [vmem:[#allocation9 + $0x178] sm:$0xff]  ;;  %v3699_v34 = vpack.c.bf16 %v435_v24, %v431_v23 }
  0xb6   : > { %2453 = vmatpush1.bf16.msra.mxu1 %v3664_v6  ;;  %614 = vmatprep.mubr.f32.mxu0 %v3352_v0  ;;  %v437_v35 = vld [vmem:[#allocation9 + $0x140] sm:$0xff]  ;;  %v3708_v38 = vpack.c.bf16 %v442_v27, %v438_v26  ;;  %v439_v40 = vld [vmem:[#allocation9 + $0x150] sm:$0xff]  ;;  %v3712_v42 = vpack.c.bf16 %v444_v33, %v440_v32  ;;  %v446_v44 = vld [vmem:[#allocation9 + $0x188] sm:$0xff]  ;;  %v487_v33 = vlaneseq }
  0xb7   : > { %727 = vmatprep.mubr.f32.mxu1 %v3352_v0  ;;  %2423 = vmatprep.subr.bf16.mxu0 %v3668_v9  ;;  %v441_v37 = vld [vmem:[#allocation9 + $0x160] sm:$0xff]  ;;  %v443_v41 = vld [vmem:[#allocation9 + $0x170] sm:$0xff]  ;;  %v450_v45 = vld [vmem:[#allocation9 + $0x1a8] sm:$0xff] }
  0xb8   : > { %2377 = vmatmul.mubr.msk.f32.gmra.mrb[6].mxu0 %vm507_vm0, %v464_v15  ;;  %2455 = vmatprep.subr.bf16.mxu1 %v3672_v12  ;;  %v466_v46 = vld [vmem:[%s3596_s9 + $0x28] sm:$0xff]  ;;  %v3717_v47 = vpack.c.bf16 %v441_v37, %v437_v35  ;;  %v3721_v52 = vpack.c.bf16 %v443_v41, %v439_v40  ;;  %v445_v53 = vld [vmem:[#allocation9 + $0x180] sm:$0xff]  ;;  %v3726_v56 = vpack.c.bf16 %v450_v45, %v446_v44  ;;  %v447_v57 = vld [vmem:[#allocation9 + $0x190] sm:$0xff]  ;;  %v488_v35 = vshrl.u32 %v487_v33, 7 }
  0xb9   : > { %2385 = vmatmul.mubr.msk.f32.gmra.mrb[6].mxu1 %vm507_vm0, %v464_v15  ;;  %2425 = vmatpush1.bf16.msra.mxu0 %v3677_v16  ;;  %v448_v49 = vld [vmem:[#allocation9 + $0x198] sm:$0xff]  ;;  %v449_v54 = vld [vmem:[#allocation9 + $0x1a0] sm:$0xff]  ;;  %v451_v59 = vld [vmem:[#allocation9 + $0x1b0] sm:$0xff] }
  0xba   : > { %2457 = vmatpush1.bf16.msra.mxu1 %v3681_v19  ;;  %620 = vmatprep.mubr.f32.mxu0 %v3352_v0  ;;  %v452_v50 = vld [vmem:[#allocation9 + $0x1b8] sm:$0xff]  ;;  %v454_v62 = vld [vmem:[#allocation9 + $0x1c8] sm:$0xff]  ;;  %v467_v2 = vld [vmem:[%s3596_s9 + $0x30] sm:$0xff]  ;;  %v3740_v4 = vpack.c.bf16 %v449_v54, %v445_v53  ;;  %v3744_v8 = vpack.c.bf16 %v451_v59, %v447_v57  ;;  %v489_v37 = vsub.s32 0, %v488_v35  ;;  %v493_v41 = vsub.s32 1, %v488_v35 }
  0xbb   : > { %733 = vmatprep.mubr.f32.mxu1 %v3352_v0  ;;  %2427 = vmatprep.subr.bf16.mxu0 %v3686_v22  ;;  %v3735_v60 = vpack.c.bf16 %v452_v50, %v448_v49  ;;  %v458_v63 = vld [vmem:[#allocation9 + $0x1e8] sm:$0xff]  ;;  %v456_v5 = vld [vmem:[#allocation9 + $0x1d8] sm:$0xff]  ;;  %v453_v10 = vld [vmem:[#allocation9 + $0x1c0] sm:$0xff]  ;;  %v497_v45 = vsub.s32 2, %v488_v35  ;;  %v501_v59 = vsub.s32 3, %v488_v35 }
  0xbc   : > { %2378 = vmatmul.mubr.msk.f32.gmra.mrb[8].mxu0 %vm507_vm0, %v465_v28  ;;  %2459 = vmatprep.subr.bf16.mxu1 %v3690_v25  ;;  %v460_v7 = vld [vmem:[#allocation9 + $0x1f8] sm:$0xff]  ;;  %v457_v11 = vld [vmem:[#allocation9 + $0x1e0] sm:$0xff]  ;;  %v3746_v13 = vld [vmem:[%s391_s18] sm:$0xff]  ;;  %v3750_v14 = vpack.c.bf16 %v458_v63, %v454_v62 }
  0xbd   : > { %2386 = vmatmul.mubr.msk.f32.gmra.mrb[8].mxu1 %vm507_vm0, %v465_v28  ;;  %2429 = vmatpush1.bf16.msra.mxu0 %v3695_v29  ;;  %v455_v15 = vld [vmem:[#allocation9 + $0x1d0] sm:$0xff]  ;;  %v3754_v18 = vpack.c.bf16 %v460_v7, %v456_v5  ;;  %v468_v20 = vld [vmem:[%s3596_s9 + $0x38] sm:$0xff]  ;;  %v3759_v21 = vpack.c.bf16 %v457_v11, %v453_v10  ;;  %vm960_vm1 = vcmp.gt.s32.totalorder %v3746_v13, 0  ;;  %vm1137_vm2 = vcmp.gt.s32.totalorder %v3746_v13, 1 }
  0xbe   : > { %2461 = vmatpush1.bf16.msra.mxu1 %v3699_v34  ;;  %626 = vmatprep.mubr.f32.mxu0 %v3352_v0  ;;  %v459_v17 = vld [vmem:[#allocation9 + $0x1f0] sm:$0xff]  ;;  %v961_v24 = vsel %vm960_vm1, 1, %v3353_v1  ;;  %v1138_v27 = vsel %vm1137_vm2, 1, %v3353_v1  ;;  %vm1668_vm3 = vcmp.gt.s32.totalorder %v3746_v13, 4  ;;  %vm2022_vm4 = vcmp.gt.s32.totalorder %v3746_v13, 6 }
  0xbf   : > { %739 = vmatprep.mubr.f32.mxu1 %v3352_v0  ;;  %2431 = vmatprep.subr.bf16.mxu0 %v3708_v38  ;;  %v3764_v23 = vpack.c.bf16 %v459_v17, %v455_v15  ;;  %v3778_v26 = vld [vmem:[%s395_s20] sm:$0xff]  ;;  %v1669_v28 = vsel %vm1668_vm3, 1, %v3353_v1  ;;  %v2023_v32 = vsel %vm2022_vm4, 1, %v3353_v1  ;;  %vm1314_vm6 = vcmp.gt.s32.totalorder %v3746_v13, 2 }
  0xc0   : > { %2379 = vmatmul.mubr.msk.f32.gmra.mrb[10].mxu0 %vm507_vm0, %v466_v46  ;;  %2463 = vmatprep.subr.bf16.mxu1 %v3712_v42  ;;  %v485_v40 = vld [vmem:[%s4192_s6] sm:$0xf]  ;;  %vm1491_vm7 = vcmp.gt.s32.totalorder %v3746_v13, 3  ;;  %vm1845_vm8 = vcmp.gt.s32.totalorder %v3746_v13, 5  ;;  %vm2199_vm9 = vcmp.gt.s32.totalorder %v3746_v13, 7 }
  0xc1   : > { %2387 = vmatmul.mubr.msk.f32.gmra.mrb[10].mxu1 %vm507_vm0, %v466_v46  ;;  %2433 = vmatpush1.bf16.msra.mxu0 %v3717_v47  ;;  %v3830_v44 = vrot.slane %v485_v40, %v489_v37  ;;  %v3832_v46 = vrot.slane %v485_v40, %v493_v41  ;;  %v3835_v53 = vrot.slane %v485_v40, %v497_v45 }
  0xc2   : > { %2465 = vmatpush1.bf16.msra.mxu1 %v3721_v52  ;;  %632 = vmatprep.mubr.f32.mxu0 %v3352_v0  ;;  %v3839_v10 = vrot.slane %v485_v40, %v501_v59 }
  0xc3   : > { %745 = vmatprep.mubr.f32.mxu1 %v3352_v0  ;;  %2435 = vmatprep.subr.bf16.mxu0 %v3726_v56 }
  0xc4   : > { %2380 = vmatmul.mubr.msk.f32.gmra.mrb[12].mxu0 %vm507_vm0, %v467_v2  ;;  %2467 = vmatprep.subr.bf16.mxu1 %v3735_v60 }
  0xc5   : > { %2388 = vmatmul.mubr.msk.f32.gmra.mrb[12].mxu1 %vm507_vm0, %v467_v2  ;;  %2437 = vmatpush1.bf16.msra.mxu0 %v3740_v4 }
  0xc6   : > { %2469 = vmatpush1.bf16.msra.mxu1 %v3744_v8  ;;  %638 = vmatprep.mubr.f32.mxu0 %v3352_v0 }
  0xc7   : > { %751 = vmatprep.mubr.f32.mxu1 %v3352_v0  ;;  %2439 = vmatprep.subr.bf16.mxu0 %v3750_v14 }
  0xc8   : > { %2381 = vmatmul.mubr.msk.f32.gmra.mrb[14].mxu0 %vm507_vm0, %v468_v20  ;;  %2471 = vmatprep.subr.bf16.mxu1 %v3754_v18 }
  0xc9   : > { %2389 = vmatmul.mubr.msk.f32.gmra.mrb[14].mxu1 %vm507_vm0, %v468_v20  ;;  %2441 = vmatpush1.bf16.msra.mxu0 %v3759_v21 }
  0xca   : > { %2473 = vmatpush1.bf16.msra.mxu1 %v3764_v23  ;;  %860 = vmatprep.mubr.f32.mxu0 %v3352_v0 }
  0xcb   : > { %931 = vmatprep.mubr.f32.mxu1 %v3352_v0  ;;  %963 = vperm.xlu0 %3065, %v961_v24  }
  0xcc   : > { %861 = vmatmul.mubr.f32.vlgmr.msra.gmra.mrb[0].mxu0 %v3778_v26  ;;  %2475 = vmatprep.subr.bf16.mxu0 %v3624_v30 }
  0xcd   : > { %932 = vmatmul.mubr.f32.vlgmr.msra.gmra.mrb[0].mxu1 %v3778_v26  ;;  %2507 = vmatprep.subr.bf16.mxu1 %v3626_v31 }
  0xce   : > { %2477 = vmatpush1.bf16.msra.mxu0 %v3629_v36  ;;  %2509 = vmatpush1.bf16.msra.mxu1 %v3632_v39 }
  0xcf   : > { %1140 = vperm.xlu0 %3065, %v1138_v27   ;;  %2479 = vmatprep.subr.bf16.mxu0 %v3635_v43 }
  0xd0   : > { %2511 = vmatprep.subr.bf16.mxu1 %v3639_v48  ;;  %1037 = vmatprep.mubr.f32.mxu0 %v3352_v0 }
  0xd1   : > { %1108 = vmatprep.mubr.f32.mxu1 %v3352_v0 }
  0xd2   : > { %2481 = vmatpush1.bf16.msra.mxu0 %v3643_v51  ;;  %2513 = vmatpush1.bf16.msra.mxu1 %v3647_v55 }
  0xd3   : > { %1671 = vperm.xlu0 %3065, %v1669_v28   ;;  %2483 = vmatprep.subr.bf16.mxu0 %v3651_v58 }
  0xd4   : > { %2515 = vmatprep.subr.bf16.mxu1 %v3655_v61 }
  0xd6   : > { %2485 = vmatpush1.bf16.msra.mxu0 %v3660_v3  ;;  %2517 = vmatpush1.bf16.msra.mxu1 %v3664_v6 }
  0xd7   : > { %2025 = vperm.xlu0 %3065, %v2023_v32   ;;  %2487 = vmatprep.subr.bf16.mxu0 %v3668_v9  ;;  %v791_v32 = vld [vmem:[%s3606_s8] sm:$0xff]  ;;  %s3267_s8 = sshll.u32 %s3354_s5, 4  ;;  %s3268_s8 = int_to_ptr.vmem [resolvable:$false] %s3267_s8 }
  0xd8   : > { %2519 = vmatprep.subr.bf16.mxu1 %v3672_v12  ;;  %s3269_s12 = scalar_lea.vmem %s3268_s8, 256  ;;  %p3270_p13 = scmp.lt.s32.totalorder %s4144_s17, %s3268_s8 }
  0xd9   : > { %p3271_p9 = scmp.lt.s32.totalorder %s3269_s12, %s3263_s28 }
  0xda   : > { %2489 = vmatpush1.bf16.msra.mxu0 %v3677_v16  ;;  %2521 = vmatpush1.bf16.msra.mxu1 %v3681_v19 }
  0xdb   : > { %2491 = vmatprep.subr.bf16.mxu0 %v3686_v22  ;;  %2523 = vmatprep.subr.bf16.mxu1 %v3690_v25  ;;  %p3272_p10 = por %p3271_p9, %p3270_p13 }
  0xdd   : > { %p3273_p3 = pnand %p3272_p10, %p3266_p6 }
  0xde   : > { %2493 = vmatpush1.bf16.msra.mxu0 %v3695_v29  ;;  %2525 = vmatpush1.bf16.msra.mxu1 %v3699_v34 }
  0xdf   : > { %2495 = vmatprep.subr.bf16.mxu0 %v3708_v38  ;;  %2527 = vmatprep.subr.bf16.mxu1 %v3712_v42 }
  0xe2   : > { %2497 = vmatpush1.bf16.msra.mxu0 %v3717_v47  ;;  %2529 = vmatpush1.bf16.msra.mxu1 %v3721_v52 }
  0xe3   : > { %2499 = vmatprep.subr.bf16.mxu0 %v3726_v56  ;;  %2531 = vmatprep.subr.bf16.mxu1 %v3735_v60 }
  0xe6   : > { %2501 = vmatpush1.bf16.msra.mxu0 %v3740_v4  ;;  %2533 = vmatpush1.bf16.msra.mxu1 %v3744_v8 }
  0xe7   : > { %2503 = vmatprep.subr.bf16.mxu0 %v3750_v14  ;;  %2535 = vmatprep.subr.bf16.mxu1 %v3754_v18 }
  0xea   : > { %2505 = vmatpush1.bf16.msra.mxu0 %v3759_v21  ;;  %2537 = vmatpush1.bf16.msra.mxu1 %v3764_v23 }
  0xeb   : > { %2539 = vmatprep.subr.bf16.mxu0 %v3624_v30  ;;  %2571 = vmatprep.subr.bf16.mxu1 %v3626_v31 }
 0x14a   : > { %v964_v37 = vpop.permute.xlu0 %963 }
 0x14b   : > { %vm965_vm5 = vcmp.eq.s32.totalorder %v964_v37, 1 }
 0x19f   : > { %v862_v49 = vpop.f32.mrb[0].mxu0 }
 0x1a0   : > { %v2922_v50 = vadd.f32 %v862_v49, %v3830_v44  ;;  %v933_v54 = vpop.f32.mrb[0].mxu1  ;;  %v864_v57 = vpop.f32.mrb[1].mxu0 }
 0x1a1   : > { %v2923_v62 = vadd.f32 %v864_v57, %v3832_v46  ;;  %v935_v63 = vpop.f32.mrb[1].mxu1  ;;  %v2938_v7 = vadd.f32 %v933_v54, %v3835_v53 }
 0x1a2   : > { %v942_v2 = vmul.f32 0.5, %v2922_v50  ;;  %v2939_v11 = vadd.f32 %v935_v63, %v3839_v10 }
 0x1a3   : > { %v946_v5 = vmul.f32 0.5, %v2923_v62 }
 0x1a4   : > { %3067 = vtanh.f32 %v942_v2  ;;  %v951_v15 = vmul.f32 0.5, %v2939_v11  ;;  %v1492_v2 = vsel %vm1491_vm7, 1, %v3353_v1 }
 0x1a5   : > { %3069 = vtanh.f32 %v946_v5  ;;  %v1846_v5 = vsel %vm1845_vm8, 1, %v3353_v1 }
 0x1a6   : > { %3071 = vtanh.f32 %v2938_v7  ;;  %v2200_v7 = vsel %vm2199_vm9, 1, %v3353_v1 }
 0x1a7   : > { %3073 = vtanh.f32 %v951_v15 }
 0x1ae   : > { %v3068_v17 = vpop.eup %3067 }
 0x1af   : > { %v3070_v20 = vpop.eup %3069  ;;  %v944_v24 = vmul.f32 0.5, %v3068_v17 }
 0x1b0   : > { %v948_v27 = vmul.f32 0.5, %v3070_v20  ;;  %v3072_v33 = vpop.eup %3071 }
 0x1b1   : > { %v945_v28 = vadd.f32 0.5, %v944_v24  ;;  %v3074_v50 = vpop.eup %3073 }
 0x1b2   : > { %v949_v35 = vadd.f32 0.5, %v948_v27  ;;  %v953_v54 = vmul.f32 0.5, %v3074_v50 }
 0x1b3   : > { %v956_v41 = vmul.f32 %v3072_v33, %v945_v28 }
 0x1b4   : > { %v955_v45 = vmul.f32 %v949_v35, %v791_v32  ;;  %v954_v57 = vadd.f32 0.5, %v953_v54 }
 0x1b6   : > { %v957_v40 = vadd.f32 %v956_v41, %v955_v45 }
 0x1b8   : > { %3075 = vtanh.f32 %v957_v40  ;;  %v3843_v49 = vsel %vm965_vm5, %v957_v40, %v791_v32 }
 0x1c2   : > { %v3076_v59 = vpop.eup %3075 }
 0x1c3   : > { %v959_v62 = vmul.f32 %v3076_v59, %v954_v57 }
 0x1c5   : > { %v3846_v63 = vsel %vm965_vm5, %v959_v62, %v3778_v26  ;;  %v1315_v26 = vsel %vm1314_vm6, 1, %v3353_v1  ;;  %v1141_v62 = vpop.permute.xlu0 %1140 }
 0x1c6   : > { %1038 = vmatmul.mubr.f32.vlgmr.msra.gmra.mrb[2].mxu0 %v3846_v63  ;;  %1109 = vmatmul.mubr.f32.vlgmr.msra.gmra.mrb[2].mxu1 %v3846_v63  ;;  %vm1142_vm10 = vcmp.eq.s32.totalorder %v1141_v62, 1 }
 0x1c7   : > { %2541 = vmatpush1.bf16.msra.mxu0 %v3629_v36  ;;  %2573 = vmatpush1.bf16.msra.mxu1 %v3632_v39 }
 0x1c8   : > { %2543 = vmatprep.subr.bf16.mxu0 %v3635_v43  ;;  %2575 = vmatprep.subr.bf16.mxu1 %v3639_v48 }
 0x1c9   : > { %1214 = vmatprep.mubr.f32.mxu0 %v3352_v0  ;;  %1285 = vmatprep.mubr.f32.mxu1 %v3352_v0 }
 0x1ca   : > { %1317 = vperm.xlu1 %3066, %v1315_v26  }
 0x1cb   : > { %2545 = vmatpush1.bf16.msra.mxu0 %v3643_v51  ;;  %2577 = vmatpush1.bf16.msra.mxu1 %v3647_v55 }
 0x1cc   : > { %2547 = vmatprep.subr.bf16.mxu0 %v3651_v58  ;;  %2579 = vmatprep.subr.bf16.mxu1 %v3655_v61 }
 0x1ce   : > { %1494 = vperm.xlu1 %3066, %v1492_v2  }
 0x1cf   : > { %2549 = vmatpush1.bf16.msra.mxu0 %v3660_v3  ;;  %2581 = vmatpush1.bf16.msra.mxu1 %v3664_v6 }
 0x1d0   : > { %2551 = vmatprep.subr.bf16.mxu0 %v3668_v9  ;;  %2583 = vmatprep.subr.bf16.mxu1 %v3672_v12 }
 0x1d2   : > { %1848 = vperm.xlu1 %3066, %v1846_v5  }
 0x1d3   : > { %2553 = vmatpush1.bf16.msra.mxu0 %v3677_v16  ;;  %2585 = vmatpush1.bf16.msra.mxu1 %v3681_v19 }
 0x1d4   : > { %2555 = vmatprep.subr.bf16.mxu0 %v3686_v22  ;;  %2587 = vmatprep.subr.bf16.mxu1 %v3690_v25 }
 0x1d6   : > { %2202 = vperm.xlu1 %3066, %v2200_v7  }
 0x1d7   : > { %2557 = vmatpush1.bf16.msra.mxu0 %v3695_v29  ;;  %2589 = vmatpush1.bf16.msra.mxu1 %v3699_v34 }
 0x1d8   : > { %2559 = vmatprep.subr.bf16.mxu0 %v3708_v38  ;;  %2591 = vmatprep.subr.bf16.mxu1 %v3712_v42 }
 0x1db   : > { %2561 = vmatpush1.bf16.msra.mxu0 %v3717_v47  ;;  %2593 = vmatpush1.bf16.msra.mxu1 %v3721_v52 }
 0x1dc   : > { %2563 = vmatprep.subr.bf16.mxu0 %v3726_v56  ;;  %2595 = vmatprep.subr.bf16.mxu1 %v3735_v60 }
 0x1df   : > { %2565 = vmatpush1.bf16.msra.mxu0 %v3740_v4  ;;  %2597 = vmatpush1.bf16.msra.mxu1 %v3744_v8 }
 0x1e0   : > { %2567 = vmatprep.subr.bf16.mxu0 %v3750_v14  ;;  %2599 = vmatprep.subr.bf16.mxu1 %v3754_v18 }
 0x1e3   : > { %2569 = vmatpush1.bf16.msra.mxu0 %v3759_v21  ;;  %2601 = vmatpush1.bf16.msra.mxu1 %v3764_v23 }
 0x1e4   : > { %2603 = vmatprep.subr.bf16.mxu0 %v3624_v30  ;;  %2635 = vmatprep.subr.bf16.mxu1 %v3626_v31 }
 0x249   : > { %v1318_v62 = vpop.permute.xlu1 %1317 }
 0x24a   : > { %vm1319_vm11 = vcmp.eq.s32.totalorder %v1318_v62, 1 }
 0x299   : > { %v1039_v11 = vpop.f32.mrb[2].mxu0  ;;  %v1110_v15 = vpop.f32.mrb[2].mxu1 }
 0x29a   : > { %v2924_v17 = vadd.f32 %v1039_v11, %v3830_v44  ;;  %v1041_v20 = vpop.f32.mrb[3].mxu0  ;;  %v1112_v24 = vpop.f32.mrb[3].mxu1  ;;  %v2940_v33 = vadd.f32 %v1110_v15, %v3835_v53 }
 0x29b   : > { %v2925_v27 = vadd.f32 %v1041_v20, %v3832_v46  ;;  %v2941_v13 = vadd.f32 %v1112_v24, %v3839_v10 }
 0x29c   : > { %v1119_v28 = vmul.f32 0.5, %v2924_v17 }
 0x29d   : > { %v1123_v32 = vmul.f32 0.5, %v2925_v27  ;;  %v1128_v35 = vmul.f32 0.5, %v2941_v13 }
 0x29e   : > { %3077 = vtanh.f32 %v1119_v28 }
 0x29f   : > { %3079 = vtanh.f32 %v1123_v32 }
 0x2a0   : > { %3081 = vtanh.f32 %v2940_v33 }
 0x2a1   : > { %3083 = vtanh.f32 %v1128_v35 }
 0x2a8   : > { %v3078_v1 = vpop.eup %3077 }
 0x2a9   : > { %v3080_v37 = vpop.eup %3079  ;;  %v1121_v41 = vmul.f32 0.5, %v3078_v1 }
 0x2aa   : > { %v1125_v45 = vmul.f32 0.5, %v3080_v37  ;;  %v3082_v50 = vpop.eup %3081 }
 0x2ab   : > { %v1122_v40 = vadd.f32 0.5, %v1121_v41  ;;  %v3084_v5 = vpop.eup %3083 }
 0x2ac   : > { %v1126_v54 = vadd.f32 0.5, %v1125_v45  ;;  %v1130_v7 = vmul.f32 0.5, %v3084_v5 }
 0x2ad   : > { %v1133_v57 = vmul.f32 %v3082_v50, %v1122_v40 }
 0x2ae   : > { %v1132_v59 = vmul.f32 %v1126_v54, %v3843_v49  ;;  %v1131_v11 = vadd.f32 0.5, %v1130_v7 }
 0x2b0   : > { %v1134_v26 = vadd.f32 %v1133_v57, %v1132_v59 }
 0x2b2   : > { %3085 = vtanh.f32 %v1134_v26  ;;  %v3898_v2 = vsel %vm1142_vm10, %v1134_v26, %v3843_v49 }
 0x2bc   : > { %v3086_v15 = vpop.eup %3085 }
 0x2bd   : > { %v1136_v17 = vmul.f32 %v3086_v15, %v1131_v11 }
 0x2bf   : > { %v3901_v20 = vsel %vm1142_vm10, %v1136_v17, %v3846_v63 }
 0x2c0   : > { %1215 = vmatmul.mubr.f32.vlgmr.msra.gmra.mrb[4].mxu0 %v3901_v20  ;;  %1286 = vmatmul.mubr.f32.vlgmr.msra.gmra.mrb[4].mxu1 %v3901_v20 }
 0x2c1   : > { %2605 = vmatpush1.bf16.msra.mxu0 %v3629_v36  ;;  %2637 = vmatpush1.bf16.msra.mxu1 %v3632_v39 }
 0x2c2   : > { %2607 = vmatprep.subr.bf16.mxu0 %v3635_v43  ;;  %2639 = vmatprep.subr.bf16.mxu1 %v3639_v48 }
 0x2c3   : > { %1391 = vmatprep.mubr.f32.mxu0 %v3352_v0  ;;  %1462 = vmatprep.mubr.f32.mxu1 %v3352_v0 }
 0x2c5   : > { %2609 = vmatpush1.bf16.msra.mxu0 %v3643_v51  ;;  %2641 = vmatpush1.bf16.msra.mxu1 %v3647_v55 }
 0x2c6   : > { %2611 = vmatprep.subr.bf16.mxu0 %v3651_v58  ;;  %2643 = vmatprep.subr.bf16.mxu1 %v3655_v61 }
 0x2c9   : > { %2613 = vmatpush1.bf16.msra.mxu0 %v3660_v3  ;;  %2645 = vmatpush1.bf16.msra.mxu1 %v3664_v6 }
 0x2ca   : > { %2615 = vmatprep.subr.bf16.mxu0 %v3668_v9  ;;  %2647 = vmatprep.subr.bf16.mxu1 %v3672_v12 }
 0x2cd   : > { %2617 = vmatpush1.bf16.msra.mxu0 %v3677_v16  ;;  %2649 = vmatpush1.bf16.msra.mxu1 %v3681_v19 }
 0x2ce   : > { %2619 = vmatprep.subr.bf16.mxu0 %v3686_v22  ;;  %2651 = vmatprep.subr.bf16.mxu1 %v3690_v25 }
 0x2d1   : > { %2621 = vmatpush1.bf16.msra.mxu0 %v3695_v29  ;;  %2653 = vmatpush1.bf16.msra.mxu1 %v3699_v34 }
 0x2d2   : > { %2623 = vmatprep.subr.bf16.mxu0 %v3708_v38  ;;  %2655 = vmatprep.subr.bf16.mxu1 %v3712_v42 }
 0x2d5   : > { %2625 = vmatpush1.bf16.msra.mxu0 %v3717_v47  ;;  %2657 = vmatpush1.bf16.msra.mxu1 %v3721_v52 }
 0x2d6   : > { %2627 = vmatprep.subr.bf16.mxu0 %v3726_v56  ;;  %2659 = vmatprep.subr.bf16.mxu1 %v3735_v60 }
 0x2d9   : > { %2629 = vmatpush1.bf16.msra.mxu0 %v3740_v4  ;;  %2661 = vmatpush1.bf16.msra.mxu1 %v3744_v8 }
 0x2da   : > { %2631 = vmatprep.subr.bf16.mxu0 %v3750_v14  ;;  %2663 = vmatprep.subr.bf16.mxu1 %v3754_v18 }
 0x2dd   : > { %2633 = vmatpush1.bf16.msra.mxu0 %v3759_v21  ;;  %2665 = vmatpush1.bf16.msra.mxu1 %v3764_v23 }
 0x2de   : > { %2667 = vmatprep.subr.bf16.mxu0 %v3624_v30  ;;  %2699 = vmatprep.subr.bf16.mxu1 %v3626_v31 }
 0x393   : > { %v1216_v49 = vpop.f32.mrb[4].mxu0  ;;  %v1287_v63 = vpop.f32.mrb[4].mxu1 }
 0x394   : > { %v2926_v24 = vadd.f32 %v1216_v49, %v3830_v44  ;;  %v1218_v27 = vpop.f32.mrb[5].mxu0  ;;  %v1289_v28 = vpop.f32.mrb[5].mxu1  ;;  %v2942_v35 = vadd.f32 %v1287_v63, %v3835_v53 }
 0x395   : > { %v2927_v32 = vadd.f32 %v1218_v27, %v3832_v46  ;;  %v2943_v1 = vadd.f32 %v1289_v28, %v3839_v10 }
 0x396   : > { %v1296_v33 = vmul.f32 0.5, %v2926_v24 }
 0x397   : > { %v1300_v13 = vmul.f32 0.5, %v2927_v32  ;;  %v1305_v37 = vmul.f32 0.5, %v2943_v1 }
 0x398   : > { %3087 = vtanh.f32 %v1296_v33 }
 0x399   : > { %3089 = vtanh.f32 %v1300_v13 }
 0x39a   : > { %3091 = vtanh.f32 %v2942_v35 }
 0x39b   : > { %3093 = vtanh.f32 %v1305_v37 }
 0x3a2   : > { %v3088_v41 = vpop.eup %3087 }
 0x3a3   : > { %v3090_v45 = vpop.eup %3089  ;;  %v1298_v40 = vmul.f32 0.5, %v3088_v41 }
 0x3a4   : > { %v1302_v50 = vmul.f32 0.5, %v3090_v45  ;;  %v3092_v57 = vpop.eup %3091 }
 0x3a5   : > { %v1299_v54 = vadd.f32 0.5, %v1298_v40  ;;  %v3094_v15 = vpop.eup %3093 }
 0x3a6   : > { %v1303_v59 = vadd.f32 0.5, %v1302_v50  ;;  %v1307_v17 = vmul.f32 0.5, %v3094_v15  ;;  %v1495_v15 = vpop.permute.xlu1 %1494 }
 0x3a7   : > { %v1310_v26 = vmul.f32 %v3092_v57, %v1299_v54  ;;  %vm1496_vm12 = vcmp.eq.s32.totalorder %v1495_v15, 1 }
 0x3a8   : > { %v1309_v5 = vmul.f32 %v1303_v59, %v3898_v2  ;;  %v1308_v49 = vadd.f32 0.5, %v1307_v17 }
 0x3aa   : > { %v1311_v7 = vadd.f32 %v1310_v26, %v1309_v5 }
 0x3ac   : > { %3095 = vtanh.f32 %v1311_v7  ;;  %v3945_v11 = vsel %vm1319_vm11, %v1311_v7, %v3898_v2 }
 0x3b6   : > { %v3096_v63 = vpop.eup %3095 }
 0x3b7   : > { %v1313_v24 = vmul.f32 %v3096_v63, %v1308_v49 }
 0x3b9   : > { %v3948_v27 = vsel %vm1319_vm11, %v1313_v24, %v3901_v20 }
 0x3ba   : > { %1392 = vmatmul.mubr.f32.vlgmr.msra.gmra.mrb[6].mxu0 %v3948_v27  ;;  %1463 = vmatmul.mubr.f32.vlgmr.msra.gmra.mrb[6].mxu1 %v3948_v27 }
 0x3bb   : > { %2669 = vmatpush1.bf16.msra.mxu0 %v3629_v36  ;;  %2701 = vmatpush1.bf16.msra.mxu1 %v3632_v39 }
 0x3bc   : > { %2671 = vmatprep.subr.bf16.mxu0 %v3635_v43  ;;  %2703 = vmatprep.subr.bf16.mxu1 %v3639_v48 }
 0x3bd   : > { %1568 = vmatprep.mubr.f32.mxu0 %v3352_v0  ;;  %1639 = vmatprep.mubr.f32.mxu1 %v3352_v0 }
 0x3bf   : > { %2673 = vmatpush1.bf16.msra.mxu0 %v3643_v51  ;;  %2705 = vmatpush1.bf16.msra.mxu1 %v3647_v55 }
 0x3c0   : > { %2675 = vmatprep.subr.bf16.mxu0 %v3651_v58  ;;  %2707 = vmatprep.subr.bf16.mxu1 %v3655_v61 }
 0x3c3   : > { %2677 = vmatpush1.bf16.msra.mxu0 %v3660_v3  ;;  %2709 = vmatpush1.bf16.msra.mxu1 %v3664_v6 }
 0x3c4   : > { %2679 = vmatprep.subr.bf16.mxu0 %v3668_v9  ;;  %2711 = vmatprep.subr.bf16.mxu1 %v3672_v12 }
 0x3c7   : > { %2681 = vmatpush1.bf16.msra.mxu0 %v3677_v16  ;;  %2713 = vmatpush1.bf16.msra.mxu1 %v3681_v19 }
 0x3c8   : > { %2683 = vmatprep.subr.bf16.mxu0 %v3686_v22  ;;  %2715 = vmatprep.subr.bf16.mxu1 %v3690_v25 }
 0x3cb   : > { %2685 = vmatpush1.bf16.msra.mxu0 %v3695_v29  ;;  %2717 = vmatpush1.bf16.msra.mxu1 %v3699_v34 }
 0x3cc   : > { %2687 = vmatprep.subr.bf16.mxu0 %v3708_v38  ;;  %2719 = vmatprep.subr.bf16.mxu1 %v3712_v42 }
 0x3cf   : > { %2689 = vmatpush1.bf16.msra.mxu0 %v3717_v47  ;;  %2721 = vmatpush1.bf16.msra.mxu1 %v3721_v52 }
 0x3d0   : > { %2691 = vmatprep.subr.bf16.mxu0 %v3726_v56  ;;  %2723 = vmatprep.subr.bf16.mxu1 %v3735_v60 }
 0x3d3   : > { %2693 = vmatpush1.bf16.msra.mxu0 %v3740_v4  ;;  %2725 = vmatpush1.bf16.msra.mxu1 %v3744_v8 }
 0x3d4   : > { %2695 = vmatprep.subr.bf16.mxu0 %v3750_v14  ;;  %2727 = vmatprep.subr.bf16.mxu1 %v3754_v18 }
 0x3d7   : > { %2697 = vmatpush1.bf16.msra.mxu0 %v3759_v21  ;;  %2729 = vmatpush1.bf16.msra.mxu1 %v3764_v23 }
 0x3d8   : > { %2731 = vmatprep.subr.bf16.mxu0 %v3624_v30  ;;  %2763 = vmatprep.subr.bf16.mxu1 %v3626_v31 }
 0x48d   : > { %v1393_v2 = vpop.f32.mrb[6].mxu0  ;;  %v1464_v20 = vpop.f32.mrb[6].mxu1 }
 0x48e   : > { %v2928_v28 = vadd.f32 %v1393_v2, %v3830_v44  ;;  %v1395_v32 = vpop.f32.mrb[7].mxu0  ;;  %v1466_v33 = vpop.f32.mrb[7].mxu1  ;;  %v2944_v37 = vadd.f32 %v1464_v20, %v3835_v53 }
 0x48f   : > { %v2929_v13 = vadd.f32 %v1395_v32, %v3832_v46  ;;  %v2945_v41 = vadd.f32 %v1466_v33, %v3839_v10 }
 0x490   : > { %v1473_v35 = vmul.f32 0.5, %v2928_v28 }
 0x491   : > { %v1477_v1 = vmul.f32 0.5, %v2929_v13  ;;  %v1482_v45 = vmul.f32 0.5, %v2945_v41 }
 0x492   : > { %3097 = vtanh.f32 %v1473_v35 }
 0x493   : > { %3099 = vtanh.f32 %v1477_v1 }
 0x494   : > { %3101 = vtanh.f32 %v2944_v37 }
 0x495   : > { %3103 = vtanh.f32 %v1482_v45 }
 0x49c   : > { %v3098_v40 = vpop.eup %3097 }
 0x49d   : > { %v3100_v50 = vpop.eup %3099  ;;  %v1475_v54 = vmul.f32 0.5, %v3098_v40 }
 0x49e   : > { %v1479_v57 = vmul.f32 0.5, %v3100_v50  ;;  %v3102_v62 = vpop.eup %3101 }
 0x49f   : > { %v1476_v59 = vadd.f32 0.5, %v1475_v54  ;;  %v3104_v63 = vpop.eup %3103 }
 0x4a0   : > { %v1480_v26 = vadd.f32 0.5, %v1479_v57  ;;  %v1484_v24 = vmul.f32 0.5, %v3104_v63  ;;  %v1672_v63 = vpop.permute.xlu0 %1671 }
 0x4a1   : > { %v1487_v5 = vmul.f32 %v3102_v62, %v1476_v59  ;;  %vm1673_vm13 = vcmp.eq.s32.totalorder %v1672_v63, 1  ;;  %v1849_v63 = vpop.permute.xlu1 %1848 }
 0x4a2   : > { %v1486_v7 = vmul.f32 %v1480_v26, %v3945_v11  ;;  %v1485_v2 = vadd.f32 0.5, %v1484_v24  ;;  %vm1850_vm14 = vcmp.eq.s32.totalorder %v1849_v63, 1 }
 0x4a4   : > { %v1488_v17 = vadd.f32 %v1487_v5, %v1486_v7 }
 0x4a6   : > { %3105 = vtanh.f32 %v1488_v17  ;;  %v3992_v49 = vsel %vm1496_vm12, %v1488_v17, %v3945_v11 }
 0x4b0   : > { %v3106_v20 = vpop.eup %3105 }
 0x4b1   : > { %v1490_v28 = vmul.f32 %v3106_v20, %v1485_v2 }
 0x4b3   : > { %v3995_v32 = vsel %vm1496_vm12, %v1490_v28, %v3948_v27 }
 0x4b4   : > { %1569 = vmatmul.mubr.f32.vlgmr.msra.gmra.mrb[8].mxu0 %v3995_v32  ;;  %1640 = vmatmul.mubr.f32.vlgmr.msra.gmra.mrb[8].mxu1 %v3995_v32 }
 0x4b5   : > { %2733 = vmatpush1.bf16.msra.mxu0 %v3629_v36  ;;  %2765 = vmatpush1.bf16.msra.mxu1 %v3632_v39 }
 0x4b6   : > { %2735 = vmatprep.subr.bf16.mxu0 %v3635_v43  ;;  %2767 = vmatprep.subr.bf16.mxu1 %v3639_v48 }
 0x4b7   : > { %1745 = vmatprep.mubr.f32.mxu0 %v3352_v0  ;;  %1816 = vmatprep.mubr.f32.mxu1 %v3352_v0 }
 0x4b9   : > { %2737 = vmatpush1.bf16.msra.mxu0 %v3643_v51  ;;  %2769 = vmatpush1.bf16.msra.mxu1 %v3647_v55 }
 0x4ba   : > { %2739 = vmatprep.subr.bf16.mxu0 %v3651_v58  ;;  %2771 = vmatprep.subr.bf16.mxu1 %v3655_v61 }
 0x4bd   : > { %2741 = vmatpush1.bf16.msra.mxu0 %v3660_v3  ;;  %2773 = vmatpush1.bf16.msra.mxu1 %v3664_v6 }
 0x4be   : > { %2743 = vmatprep.subr.bf16.mxu0 %v3668_v9  ;;  %2775 = vmatprep.subr.bf16.mxu1 %v3672_v12 }
 0x4c1   : > { %2745 = vmatpush1.bf16.msra.mxu0 %v3677_v16  ;;  %2777 = vmatpush1.bf16.msra.mxu1 %v3681_v19 }
 0x4c2   : > { %2747 = vmatprep.subr.bf16.mxu0 %v3686_v22  ;;  %2779 = vmatprep.subr.bf16.mxu1 %v3690_v25 }
 0x4c5   : > { %2749 = vmatpush1.bf16.msra.mxu0 %v3695_v29  ;;  %2781 = vmatpush1.bf16.msra.mxu1 %v3699_v34 }
 0x4c6   : > { %2751 = vmatprep.subr.bf16.mxu0 %v3708_v38  ;;  %2783 = vmatprep.subr.bf16.mxu1 %v3712_v42 }
 0x4c9   : > { %2753 = vmatpush1.bf16.msra.mxu0 %v3717_v47  ;;  %2785 = vmatpush1.bf16.msra.mxu1 %v3721_v52 }
 0x4ca   : > { %2755 = vmatprep.subr.bf16.mxu0 %v3726_v56  ;;  %2787 = vmatprep.subr.bf16.mxu1 %v3735_v60 }
 0x4cd   : > { %2757 = vmatpush1.bf16.msra.mxu0 %v3740_v4  ;;  %2789 = vmatpush1.bf16.msra.mxu1 %v3744_v8 }
 0x4ce   : > { %2759 = vmatprep.subr.bf16.mxu0 %v3750_v14  ;;  %2791 = vmatprep.subr.bf16.mxu1 %v3754_v18 }
 0x4d1   : > { %2761 = vmatpush1.bf16.msra.mxu0 %v3759_v21  ;;  %2793 = vmatpush1.bf16.msra.mxu1 %v3764_v23 }
 0x4d2   : > { %2795 = vmatprep.subr.bf16.mxu0 %v3624_v30  ;;  %2827 = vmatprep.subr.bf16.mxu1 %v3626_v31 }
 0x587   : > { %v1570_v11 = vpop.f32.mrb[8].mxu0  ;;  %v1641_v27 = vpop.f32.mrb[8].mxu1 }
 0x588   : > { %v2930_v33 = vadd.f32 %v1570_v11, %v3830_v44  ;;  %v1572_v13 = vpop.f32.mrb[9].mxu0  ;;  %v1643_v35 = vpop.f32.mrb[9].mxu1  ;;  %v2946_v45 = vadd.f32 %v1641_v27, %v3835_v53 }
 0x589   : > { %v2931_v1 = vadd.f32 %v1572_v13, %v3832_v46  ;;  %v2947_v40 = vadd.f32 %v1643_v35, %v3839_v10 }
 0x58a   : > { %v1650_v37 = vmul.f32 0.5, %v2930_v33 }
 0x58b   : > { %v1654_v41 = vmul.f32 0.5, %v2931_v1  ;;  %v1659_v50 = vmul.f32 0.5, %v2947_v40 }
 0x58c   : > { %3107 = vtanh.f32 %v1650_v37 }
 0x58d   : > { %3109 = vtanh.f32 %v1654_v41 }
 0x58e   : > { %3111 = vtanh.f32 %v2946_v45 }
 0x58f   : > { %3113 = vtanh.f32 %v1659_v50 }
 0x596   : > { %v3108_v54 = vpop.eup %3107 }
 0x597   : > { %v3110_v57 = vpop.eup %3109  ;;  %v1652_v59 = vmul.f32 0.5, %v3108_v54 }
 0x598   : > { %v1656_v62 = vmul.f32 0.5, %v3110_v57  ;;  %v3112_v5 = vpop.eup %3111 }
 0x599   : > { %v1653_v26 = vadd.f32 0.5, %v1652_v59  ;;  %v3114_v20 = vpop.eup %3113 }
 0x59a   : > { %v1657_v7 = vadd.f32 0.5, %v1656_v62  ;;  %v1661_v28 = vmul.f32 0.5, %v3114_v20 }
 0x59b   : > { %v1664_v15 = vmul.f32 %v3112_v5, %v1653_v26 }
 0x59c   : > { %v1663_v17 = vmul.f32 %v1657_v7, %v3992_v49  ;;  %v1662_v11 = vadd.f32 0.5, %v1661_v28 }
 0x59e   : > { %v1665_v24 = vadd.f32 %v1664_v15, %v1663_v17 }
 0x5a0   : > { %3115 = vtanh.f32 %v1665_v24  ;;  %v4039_v2 = vsel %vm1673_vm13, %v1665_v24, %v3992_v49 }
 0x5aa   : > { %v3116_v27 = vpop.eup %3115 }
 0x5ab   : > { %v1667_v33 = vmul.f32 %v3116_v27, %v1662_v11 }
 0x5ad   : > { %v4042_v13 = vsel %vm1673_vm13, %v1667_v33, %v3995_v32 }
 0x5ae   : > { %1746 = vmatmul.mubr.f32.vlgmr.msra.gmra.mrb[10].mxu0 %v4042_v13  ;;  %1817 = vmatmul.mubr.f32.vlgmr.msra.gmra.mrb[10].mxu1 %v4042_v13 }
 0x5af   : > { %2797 = vmatpush1.bf16.msra.mxu0 %v3629_v36  ;;  %2829 = vmatpush1.bf16.msra.mxu1 %v3632_v39 }
 0x5b0   : > { %2799 = vmatprep.subr.bf16.mxu0 %v3635_v43  ;;  %2831 = vmatprep.subr.bf16.mxu1 %v3639_v48 }
 0x5b1   : > { %1922 = vmatprep.mubr.f32.mxu0 %v3352_v0  ;;  %1993 = vmatprep.mubr.f32.mxu1 %v3352_v0 }
 0x5b3   : > { %2801 = vmatpush1.bf16.msra.mxu0 %v3643_v51  ;;  %2833 = vmatpush1.bf16.msra.mxu1 %v3647_v55 }
 0x5b4   : > { %2803 = vmatprep.subr.bf16.mxu0 %v3651_v58  ;;  %2835 = vmatprep.subr.bf16.mxu1 %v3655_v61 }
 0x5b7   : > { %2805 = vmatpush1.bf16.msra.mxu0 %v3660_v3  ;;  %2837 = vmatpush1.bf16.msra.mxu1 %v3664_v6 }
 0x5b8   : > { %2807 = vmatprep.subr.bf16.mxu0 %v3668_v9  ;;  %2839 = vmatprep.subr.bf16.mxu1 %v3672_v12 }
 0x5bb   : > { %2809 = vmatpush1.bf16.msra.mxu0 %v3677_v16  ;;  %2841 = vmatpush1.bf16.msra.mxu1 %v3681_v19 }
 0x5bc   : > { %2811 = vmatprep.subr.bf16.mxu0 %v3686_v22  ;;  %2843 = vmatprep.subr.bf16.mxu1 %v3690_v25 }
 0x5bf   : > { %2813 = vmatpush1.bf16.msra.mxu0 %v3695_v29  ;;  %2845 = vmatpush1.bf16.msra.mxu1 %v3699_v34 }
 0x5c0   : > { %2815 = vmatprep.subr.bf16.mxu0 %v3708_v38  ;;  %2847 = vmatprep.subr.bf16.mxu1 %v3712_v42 }
 0x5c3   : > { %2817 = vmatpush1.bf16.msra.mxu0 %v3717_v47  ;;  %2849 = vmatpush1.bf16.msra.mxu1 %v3721_v52 }
 0x5c4   : > { %2819 = vmatprep.subr.bf16.mxu0 %v3726_v56  ;;  %2851 = vmatprep.subr.bf16.mxu1 %v3735_v60 }
 0x5c7   : > { %2821 = vmatpush1.bf16.msra.mxu0 %v3740_v4  ;;  %2853 = vmatpush1.bf16.msra.mxu1 %v3744_v8 }
 0x5c8   : > { %2823 = vmatprep.subr.bf16.mxu0 %v3750_v14  ;;  %2855 = vmatprep.subr.bf16.mxu1 %v3754_v18 }
 0x5cb   : > { %2825 = vmatpush1.bf16.msra.mxu0 %v3759_v21  ;;  %2857 = vmatpush1.bf16.msra.mxu1 %v3764_v23 }
 0x5cc   : > { %2859 = vmatprep.subr.bf16.mxu0 %v3624_v30  ;;  %2891 = vmatprep.subr.bf16.mxu1 %v3626_v31 }
 0x681   : > { %v1747_v49 = vpop.f32.mrb[10].mxu0  ;;  %v1818_v32 = vpop.f32.mrb[10].mxu1 }
 0x682   : > { %v2932_v35 = vadd.f32 %v1747_v49, %v3830_v44  ;;  %v1749_v1 = vpop.f32.mrb[11].mxu0  ;;  %v1820_v37 = vpop.f32.mrb[11].mxu1  ;;  %v2948_v50 = vadd.f32 %v1818_v32, %v3835_v53 }
 0x683   : > { %v2933_v41 = vadd.f32 %v1749_v1, %v3832_v46  ;;  %v2949_v54 = vadd.f32 %v1820_v37, %v3839_v10 }
 0x684   : > { %v1827_v45 = vmul.f32 0.5, %v2932_v35 }
 0x685   : > { %v1831_v40 = vmul.f32 0.5, %v2933_v41  ;;  %v1836_v30 = vmul.f32 0.5, %v2949_v54 }
 0x686   : > { %3117 = vtanh.f32 %v1827_v45 }
 0x687   : > { %3119 = vtanh.f32 %v1831_v40 }
 0x688   : > { %3121 = vtanh.f32 %v2948_v50 }
 0x689   : > { %3123 = vtanh.f32 %v1836_v30 }
 0x690   : > { %v3118_v57 = vpop.eup %3117 }
 0x691   : > { %v3120_v31 = vpop.eup %3119  ;;  %v1829_v59 = vmul.f32 0.5, %v3118_v57 }
 0x692   : > { %v1833_v62 = vmul.f32 0.5, %v3120_v31  ;;  %v3122_v5 = vpop.eup %3121 }
 0x693   : > { %v1830_v26 = vadd.f32 0.5, %v1829_v59  ;;  %v3124_v28 = vpop.eup %3123 }
 0x694   : > { %v1834_v7 = vadd.f32 0.5, %v1833_v62  ;;  %v1838_v11 = vmul.f32 0.5, %v3124_v28 }
 0x695   : > { %v1841_v15 = vmul.f32 %v3122_v5, %v1830_v26 }
 0x696   : > { %v1840_v17 = vmul.f32 %v1834_v7, %v4039_v2  ;;  %v1839_v27 = vadd.f32 0.5, %v1838_v11 }
 0x698   : > { %v1842_v24 = vadd.f32 %v1841_v15, %v1840_v17 }
 0x69a   : > { %3125 = vtanh.f32 %v1842_v24  ;;  %v4086_v20 = vsel %vm1850_vm14, %v1842_v24, %v4039_v2 }
 0x6a4   : > { %v3126_v33 = vpop.eup %3125 }
 0x6a5   : > { %v1844_v49 = vmul.f32 %v3126_v33, %v1839_v27 }
 0x6a7   : > { %v4089_v32 = vsel %vm1850_vm14, %v1844_v49, %v4042_v13 }
 0x6a8   : > { %1923 = vmatmul.mubr.f32.vlgmr.msra.gmra.mrb[12].mxu0 %v4089_v32  ;;  %1994 = vmatmul.mubr.f32.vlgmr.msra.gmra.mrb[12].mxu1 %v4089_v32 }
 0x6a9   : > { %2861 = vmatpush1.bf16.msra.mxu0 %v3629_v36  ;;  %2893 = vmatpush1.bf16.msra.mxu1 %v3632_v39 }
 0x6aa   : > { %2863 = vmatprep.subr.bf16.mxu0 %v3635_v43  ;;  %2895 = vmatprep.subr.bf16.mxu1 %v3639_v48 }
 0x6ab   : > { %2099 = vmatprep.mubr.f32.mxu0 %v3352_v0  ;;  %2170 = vmatprep.mubr.f32.mxu1 %v3352_v0 }
 0x6ad   : > { %2865 = vmatpush1.bf16.msra.mxu0 %v3643_v51  ;;  %2897 = vmatpush1.bf16.msra.mxu1 %v3647_v55 }
 0x6ae   : > { %2867 = vmatprep.subr.bf16.mxu0 %v3651_v58  ;;  %2899 = vmatprep.subr.bf16.mxu1 %v3655_v61 }
 0x6b1   : > { %2869 = vmatpush1.bf16.msra.mxu0 %v3660_v3  ;;  %2901 = vmatpush1.bf16.msra.mxu1 %v3664_v6 }
 0x6b2   : > { %2871 = vmatprep.subr.bf16.mxu0 %v3668_v9  ;;  %2903 = vmatprep.subr.bf16.mxu1 %v3672_v12 }
 0x6b5   : > { %2873 = vmatpush1.bf16.msra.mxu0 %v3677_v16  ;;  %2905 = vmatpush1.bf16.msra.mxu1 %v3681_v19 }
 0x6b6   : > { %2875 = vmatprep.subr.bf16.mxu0 %v3686_v22  ;;  %2907 = vmatprep.subr.bf16.mxu1 %v3690_v25 }
 0x6b9   : > { %2877 = vmatpush1.bf16.msra.mxu0 %v3695_v29  ;;  %2909 = vmatpush1.bf16.msra.mxu1 %v3699_v34 }
 0x6ba   : > { %2879 = vmatprep.subr.bf16.mxu0 %v3708_v38  ;;  %2911 = vmatprep.subr.bf16.mxu1 %v3712_v42  ;;  %v2026_v38 = vpop.permute.xlu0 %2025 }
 0x6bb   : > { %vm2027_vm15 = vcmp.eq.s32.totalorder %v2026_v38, 1 }
 0x6bd   : > { %2881 = vmatpush1.bf16.msra.mxu0 %v3717_v47  ;;  %2913 = vmatpush1.bf16.msra.mxu1 %v3721_v52 }
 0x6be   : > { %2883 = vmatprep.subr.bf16.mxu0 %v3726_v56  ;;  %2915 = vmatprep.subr.bf16.mxu1 %v3735_v60 }
 0x6c1   : > { %2885 = vmatpush1.bf16.msra.mxu0 %v3740_v4  ;;  %2917 = vmatpush1.bf16.msra.mxu1 %v3744_v8 }
 0x6c2   : > { %2887 = vmatprep.subr.bf16.mxu0 %v3750_v14  ;;  %2919 = vmatprep.subr.bf16.mxu1 %v3754_v18 }
 0x6c5   : > { %2889 = vmatpush1.bf16.msra.mxu0 %v3759_v21  ;;  %2921 = vmatpush1.bf16.msra.mxu1 %v3764_v23 }
 0x77b   : > { %v1924_v0 = vpop.f32.mrb[12].mxu0  ;;  %v1995_v36 = vpop.f32.mrb[12].mxu1 }
 0x77c   : > { %v2934_v39 = vadd.f32 %v1924_v0, %v3830_v44  ;;  %v1926_v43 = vpop.f32.mrb[13].mxu0  ;;  %v1997_v48 = vpop.f32.mrb[13].mxu1  ;;  %v2950_v61 = vadd.f32 %v1995_v36, %v3835_v53 }
 0x77d   : > { %v2935_v51 = vadd.f32 %v1926_v43, %v3832_v46  ;;  %v2951_v3 = vadd.f32 %v1997_v48, %v3839_v10 }
 0x77e   : > { %v2004_v55 = vmul.f32 0.5, %v2934_v39 }
 0x77f   : > { %v2008_v58 = vmul.f32 0.5, %v2935_v51  ;;  %v2013_v6 = vmul.f32 0.5, %v2951_v3 }
 0x780   : > { %3127 = vtanh.f32 %v2004_v55 }
 0x781   : > { %3129 = vtanh.f32 %v2008_v58 }
 0x782   : > { %3131 = vtanh.f32 %v2950_v61 }
 0x783   : > { %3133 = vtanh.f32 %v2013_v6 }
 0x78a   : > { %v3128_v9 = vpop.eup %3127 }
 0x78b   : > { %v3130_v12 = vpop.eup %3129  ;;  %v2006_v16 = vmul.f32 0.5, %v3128_v9 }
 0x78c   : > { %v2010_v19 = vmul.f32 0.5, %v3130_v12  ;;  %v3132_v25 = vpop.eup %3131 }
 0x78d   : > { %v2007_v22 = vadd.f32 0.5, %v2006_v16  ;;  %v3134_v56 = vpop.eup %3133 }
 0x78e   : > { %v2011_v29 = vadd.f32 0.5, %v2010_v19  ;;  %v2015_v60 = vmul.f32 0.5, %v3134_v56 }
 0x78f   : > { %v2018_v34 = vmul.f32 %v3132_v25, %v2007_v22 }
 0x790   : > { %v2017_v42 = vmul.f32 %v2011_v29, %v4086_v20  ;;  %v2016_v4 = vadd.f32 0.5, %v2015_v60 }
 0x792   : > { %v2019_v47 = vadd.f32 %v2018_v34, %v2017_v42 }
 0x794   : > { %3135 = vtanh.f32 %v2019_v47  ;;  %v2029_v52 = vsel %vm2027_vm15, %v2019_v47, %v4086_v20 }
 0x79e   : > { %v3136_v8 = vpop.eup %3135 }
 0x79f   : > { %v2021_v14 = vmul.f32 %v3136_v8, %v2016_v4 }
 0x7a1   : > { %v2028_v18 = vsel %vm2027_vm15, %v2021_v14, %v4089_v32 }
 0x7a2   : > { %2100 = vmatmul.mubr.f32.vlgmr.msra.gmra.mrb[14].mxu0 %v2028_v18  ;;  %2171 = vmatmul.mubr.f32.vlgmr.msra.gmra.mrb[14].mxu1 %v2028_v18 }
 0x875   : > { %v2101_v21 = vpop.f32.mrb[14].mxu0  ;;  %v2172_v23 = vpop.f32.mrb[14].mxu1 }
 0x876   : > { %v2936_v2 = vadd.f32 %v2101_v21, %v3830_v44  ;;  %v2103_v13 = vpop.f32.mrb[15].mxu0  ;;  %v2174_v35 = vpop.f32.mrb[15].mxu1  ;;  %v2952_v45 = vadd.f32 %v2172_v23, %v3835_v53 }
 0x877   : > { %v2937_v1 = vadd.f32 %v2103_v13, %v3832_v46  ;;  %v2953_v40 = vadd.f32 %v2174_v35, %v3839_v10  ;;  %v2203_v10 = vpop.permute.xlu1 %2202 }
 0x878   : > { %v2181_v37 = vmul.f32 0.5, %v2936_v2  ;;  %vm2204_vm0 = vcmp.eq.s32.totalorder %v2203_v10, 1 }
 0x879   : > { %v2185_v41 = vmul.f32 0.5, %v2937_v1  ;;  %v2190_v50 = vmul.f32 0.5, %v2953_v40 }
 0x87a   : > { %3137 = vtanh.f32 %v2181_v37 }
 0x87b   : > { %3139 = vtanh.f32 %v2185_v41 }
 0x87c   : > { %3141 = vtanh.f32 %v2952_v45 }
 0x87d   : > { %3143 = vtanh.f32 %v2190_v50 }
 0x884   : > { %v3138_v54 = vpop.eup %3137 }
 0x885   : > { %v3140_v30 = vpop.eup %3139  ;;  %v2183_v57 = vmul.f32 0.5, %v3138_v54 }
 0x886   : > { %v2187_v44 = vmul.f32 0.5, %v3140_v30  ;;  %v3142_v59 = vpop.eup %3141 }
 0x887   : > { %v2184_v31 = vadd.f32 0.5, %v2183_v57  ;;  %v3144_v53 = vpop.eup %3143 }
 0x888   : > { %v2188_v46 = vadd.f32 0.5, %v2187_v44  ;;  %v2192_v7 = vmul.f32 0.5, %v3144_v53 }
 0x889   : > { %v2195_v62 = vmul.f32 %v3142_v59, %v2184_v31 }
 0x88a   : > { %v2194_v26 = vmul.f32 %v2188_v46, %v2029_v52  ;;  %v2193_v15 = vadd.f32 0.5, %v2192_v7 }
 0x88c   : > { %v2196_v5 = vadd.f32 %v2195_v62, %v2194_v26 }
 0x88e   : > { %3145 = vtanh.f32 %v2196_v5 }
 0x898   : > { %v3146_v17 = vpop.eup %3145 }
 0x899   : > { %v2198_v63 = vmul.f32 %v3146_v17, %v2193_v15 }
 0x89b   : > { %v2205_v24 = vsel %vm2204_vm0, %v2198_v63, %v2028_v18 }
 0x89c   : > { %2206 = vst [vmem:[%s387_s19] sm:$0xff] %v2205_v24 }
 0x89d   : > { %3276 = shalt.err (!%p3273_p3)
}
 0x89e   : > { %s3277_s26 = scalar_lea.hbm %s4142_s4, 128  ;;  %s3281_s29 = scalar_lea.hbm %s4193_s7, 256 }
 0x89f   : > { %p3278_p4 = scmp.ne.s32.totalorder %s4142_s4, %s3277_s26  ;;  %p3282_p0 = scmp.lt.u32.totalorder %s4142_s4, %s4193_s7 }
 0x8a0   : > { %p3283_p7 = scmp.lt.u32.totalorder %s3281_s29, %s3277_s26  ;;  %p3285_p5 = scmp.lt.u32.totalorder %s3277_s26, %s4142_s4 }
 0x8a1   : > { %p3279_p8 = pnand %p3278_p4, %p4227_p11 }
 0x8a2   : > { %p3284_p2 = por %p3283_p7, %p3282_p0 }
 0x8a3   : > { %p3280_p1 = pneg %p3279_p8 }
 0x8a4   : > { %p3286_p12 = por %p3285_p5, %p3284_p2 }
 0x8a6   : > { %p3287_p6 = pnand %p3286_p12, %p3280_p1 }
 0x8a8   : > { %3290 = shalt.err (!%p3287_p6)
}
 0x8a9   : > { %2998 = dma.vmem_to_hbm [thread:$0]  (%p4227_p11), %s4144_s17, 128, %s4142_s4, %s2208_s15  }
 0x8aa PF: > { %s2233_s16 = sand.u32 1, %s3329_s24   ;;  %p4228_p13 = scmp.ne.s32.totalorder %s4211_s14, 0 }
 0x8ab   : > { %p4229_p9 = scmp.ge.s32.totalorder %s3341_s27, 2  ;;  %s2234_s20 = scalar_lea.sflag [#allocation5], %s2233_s16 }
 0x8ad   : > { %p3015_p10 = pnand %p4229_p9, %p4228_p13 }
 0x8af   : > { %3324 = dma.done.wait (!%p3015_p10), %s2234_s20, 128  }
 0x8b0   : > { %3326 = vsyncadd (!%p3015_p10), %s2234_s20, 4294967168  ;;  %s4230_s27 = sld [smem:[#allocation18_spill]]  ;;  %s4231_s0 = sld [smem:[#allocation17_spill]] }
 0x8b1   : > { %s4232_s26 = sld [smem:[#allocation19_spill]]  ;;  %s4233_s24 = smov %s3333_s25 }
 0x8b6   : > { %p24_p3 = scmp.ge.s32.totalorder %s4230_s27, 4   ;;  %s4234_s25 = smov %s4231_s0 }
 0x8b8   :  { %26 = sbr.rel (!%p24_p3) target bundleno = 12 (0xc), region = 127 }
 0x8bf   :  { %2239 = vsyncpa [#allocation4], 1 }
 0x8c0   :  { %2241 = vsyncpa [#allocation4 + $0x1], 1 }
 0x8c1   :  { %2242 = vsyncpa [#allocation7], 1 }
 0x8c2   :  { %2244 = vsyncpa [#allocation7 + $0x1], 1 }
 0x8c3   :  { %2245 = vsyncpa [#allocation10], 1 }
 0x8c4   :  { %2246 = vsyncpa [#allocation5], 1 }
 0x8c5   :  { %2248 = vsyncpa [#allocation5 + $0x1], 1 }

</bundles_post_ra>
